<compile_context>
chip_gen: v5e
topology: v5e:2x2
jax: 0.10.0
libtpu: 0.0.40
codegen_flags: <defaults>
</compile_context>

<pallas_src>
import functools
import math

import jax
import jax.numpy as jnp
from jax import lax
from jax.experimental import pallas as pl
from jax.experimental.pallas import tpu as pltpu


# 3x3 tap offsets (dw, dh); tap index t = 3*(dw+1)+(dh+1) matches the row-major
# flattening of the PyTorch depthwise weight (c, 3, 3).
_TAPS = tuple((dw, dh) for dw in (-1, 0, 1) for dh in (-1, 0, 1))


# ----------------------------------------------------------------------------
# Kernel: one grid step == one PAIR of batch elements (A, B).
# ----------------------------------------------------------------------------
def _fusionv2_kernel(stk_ref, w_ref, b_ref, msk_ref, e_ref, f_ref, o_ref,
                     *, c, w, h):
    """Refs:
      stk_ref : (6c, wh)     rows [xA | xB | maskA | maskB | avgA | avgB]
      w_ref   : (9, 8c, 6c)  per-tap block weights (wrapper-built)
      b_ref   : (8c, 1)      fused biases
      msk_ref : (9, wh)      0/1 tap-validity masks (zero-pad conv boundary)
      e_ref   : (wh//c, wh)  lane "expand" matrix for the qk-view trick
      f_ref   : (wh, c)      lane "fold" matrix, 1/sqrt(wh) folded in
      o_ref   : (2c, wh)     rows [outA | outB]
    """
    wh = w * h
    rh = wh // c
    f32 = jnp.float32

    stk = stk_ref[...]                                            # (6c, wh)

    # ---- fused depthwise-separable convs: 9 masked lane-rolled taps --------
    # proj rows: [QxA QmA QxB QmB | KxA KxB | (Vx+Vavg)A (Vx+Vavg)B]
    proj = jnp.dot(w_ref[4], stk, preferred_element_type=f32) + b_ref[...]
    for t, (dw, dh) in enumerate(_TAPS):
        if t == 4:                       # centre tap already consumed above
            continue
        s = dw * h + dh
        tap = pltpu.roll(stk, (-s) % wh, 1) * msk_ref[t:t + 1, :]
        proj = proj + jnp.dot(w_ref[t], tap, preferred_element_type=f32)

    # ---- dual attention, both batch elements fused --------------------------
    # qk[a, b_] = sum_p Q[a, p] * K_view[p, b_]; the PyTorch .view(wh, c) of K
    # (a memory re-view, NOT a transpose) is reproduced relayout-free with the
    # constant E / F matrices.
    e_mat = e_ref[...]
    q_all = proj[0:4 * c, :]                                      # (4c, wh)
    acc = None
    for ci in range(c):
        qe = jnp.dot(q_all[:, ci * rh:(ci + 1) * rh], e_mat,
                     preferred_element_type=f32)                  # (4c, wh)
        k_a = proj[4 * c + ci:4 * c + ci + 1, :]                  # K(x)_A[ci]
        k_b = proj[5 * c + ci:5 * c + ci + 1, :]                  # K(x)_B[ci]
        term = jnp.concatenate([qe[0:2 * c, :] * k_a,
                                qe[2 * c:4 * c, :] * k_b], axis=0)
        acc = term if acc is None else acc + term
    s_all = jnp.dot(acc, f_ref[...], preferred_element_type=f32)  # (4c, c)

    def softmax_cc(sc):          # softmax over the full flattened (c*c) block
        m = jnp.max(jnp.max(sc, axis=-1, keepdims=True), axis=-2, keepdims=True)
        e = jnp.exp(sc - m)
        d = jnp.sum(jnp.sum(e, axis=-1, keepdims=True), axis=-2, keepdims=True)
        return e * pl.reciprocal(d, approx=True)

    att_a = softmax_cc(s_all[0:c, :]) + softmax_cc(s_all[c:2 * c, :])
    att_b = softmax_cc(s_all[2 * c:3 * c, :]) + softmax_cc(s_all[3 * c:4 * c, :])

    zero_cc = jnp.zeros((c, c), f32)
    att_blk = jnp.concatenate(
        [jnp.concatenate([att_a, zero_cc], axis=1),
         jnp.concatenate([zero_cc, att_b], axis=1)], axis=0)      # (2c, 2c)

    v_both = proj[6 * c:8 * c, :]                                 # (2c, wh)
    x_both = stk[0:2 * c, :]                                      # residual
    o_ref[...] = jnp.dot(att_blk, v_both, preferred_element_type=f32) + x_both


# ----------------------------------------------------------------------------
# Wrapper: constant folding + pallas_call.
# ----------------------------------------------------------------------------
def _fuse_dsconv(params):
    """Fold depthwise(3x3) + pointwise(1x1) into (c, 9c) weights + (c,) bias."""
    wd, bd, wp, bp = params          # (c,3,3), (c,), (c,c), (c,)
    c = wp.shape[0]
    wd9 = wd.reshape(c, 9)
    # wf[co, t*c + ci] = wp[co, ci] * wd[ci, t]
    wf = (wp[:, None, :] * jnp.transpose(wd9)[None, :, :]).reshape(c, 9 * c)
    bf = wp @ bd + bp
    return wf, bf


def _build_constants(pq, pk, pv, c, w, h):
    wh = w * h
    rh = wh // c
    f32 = jnp.float32

    wq, bq = _fuse_dsconv(pq)
    wk, bk = _fuse_dsconv(pk)
    wv, bv = _fuse_dsconv(pv)

    # Per-tap block weights (9, 8c, 6c).
    # out row-blocks: 0 QxA 1 QmA 2 QxB 3 QmB 4 KxA 5 KxB 6 VtotA 7 VtotB
    # in  col-blocks: 0 xA  1 xB  2 maskA 3 maskB 4 avgA 5 avgB
    placements = [(0, 0, wq), (1, 2, wq), (2, 1, wq), (3, 3, wq),
                  (4, 0, wk), (5, 1, wk),
                  (6, 0, wv), (6, 4, wv), (7, 1, wv), (7, 5, wv)]
    w_all = jnp.zeros((9, 8 * c, 6 * c), f32)
    for t in range(9):
        for rb, cb, wf in placements:
            w_all = w_all.at[t, rb * c:(rb + 1) * c,
                             cb * c:(cb + 1) * c].set(wf[:, t * c:(t + 1) * c])
    b_all = jnp.concatenate([bq, bq, bq, bq, bk, bk,
                             2.0 * bv, 2.0 * bv]).reshape(8 * c, 1).astype(f32)

    # Tap-validity masks (zero padding at the image boundary); row t <-> _TAPS[t].
    j = jnp.arange(wh)
    iw, ih = j // h, j % h
    msk = jnp.stack([((iw + dw >= 0) & (iw + dw < w) &
                      (ih + dh >= 0) & (ih + dh < h)).astype(f32)
                     for dw, dh in _TAPS])                         # (9, wh)

    # qk-view expand/fold constants; 1/sqrt(wh) folded into F.
    e_mat = (jnp.arange(wh)[None, :] // c
             == jnp.arange(rh)[:, None]).astype(f32)               # (rh, wh)
    f_mat = ((jnp.arange(wh)[:, None] % c
              == jnp.arange(c)[None, :]).astype(f32) / math.sqrt(wh))  # (wh, c)

    return w_all.astype(f32), b_all, msk, e_mat, f_mat


def fusionv2_forward(x, mask, avg_ct, pq, pk, pv):
    b, c, w, h = x.shape
    wh = w * h
    # TODO(synk): the relayout-free qk-view trick needs wh % c == 0 and a small
    # E ((wh/c, wh) f32 = O(wh^2/c) VMEM); switch to materializing the K view
    # when the resolution grows (v7x has only 64 MiB VMEM).
    assert wh % c == 0

    w_all, b_all, msk, e_mat, f_mat = _build_constants(pq, pk, pv, c, w, h)

    x_f = x.reshape(b, c, wh).astype(jnp.float32)
    m_f = mask.reshape(b, c, wh).astype(jnp.float32)
    a_f = avg_ct.reshape(b, c, wh).astype(jnp.float32)

    # Pair up batch elements (pad odd batch with zeros).
    bp = b + (b % 2)
    if bp != b:
        z = jnp.zeros((1, c, wh), jnp.float32)
        x_f, m_f, a_f = (jnp.concatenate([t, z], 0) for t in (x_f, m_f, a_f))
    nb = bp // 2
    stk = jnp.concatenate([x_f.reshape(nb, 2 * c, wh),
                           m_f.reshape(nb, 2 * c, wh),
                           a_f.reshape(nb, 2 * c, wh)], axis=1)    # (nb, 6c, wh)

    kern = functools.partial(_fusionv2_kernel, c=c, w=w, h=h)
    out = pl.pallas_call(
        kern,
        out_shape=jax.ShapeDtypeStruct((nb, 2 * c, wh), jnp.float32),
        grid=(nb,),
        in_specs=[
            pl.BlockSpec((None, 6 * c, wh), lambda i: (i, 0, 0)),
            pl.BlockSpec((9, 8 * c, 6 * c), lambda i: (0, 0, 0)),
            pl.BlockSpec((8 * c, 1), lambda i: (0, 0)),
            pl.BlockSpec((9, wh), lambda i: (0, 0)),
            pl.BlockSpec((wh // c, wh), lambda i: (0, 0)),
            pl.BlockSpec((wh, c), lambda i: (0, 0)),
        ],
        out_specs=pl.BlockSpec((None, 2 * c, wh), lambda i: (i, 0, 0)),
        compiler_params=pltpu.CompilerParams(
            dimension_semantics=("parallel",)),
    )(stk, w_all, b_all, msk, e_mat, f_mat)

    out = out.reshape(bp, c, wh)[:b]
    return out.reshape(b, c, w, h)


# ----------------------------------------------------------------------------
# Pure-JAX reference (correctness check only).
# ----------------------------------------------------------------------------
def dsconv_ref(x, params):
    wd, bd, wp, bp = params
    c = x.shape[1]
    d = lax.conv_general_dilated(
        x, wd[:, None], (1, 1), ((1, 1), (1, 1)),
        dimension_numbers=("NCHW", "OIHW", "NCHW"), feature_group_count=c,
        precision=lax.Precision.HIGHEST)
    d = d + bd[None, :, None, None]
    p = lax.conv_general_dilated(
        d, wp[:, :, None, None], (1, 1), ((0, 0), (0, 0)),
        dimension_numbers=("NCHW", "OIHW", "NCHW"),
        precision=lax.Precision.HIGHEST)
    return p + bp[None, :, None, None]


def fusionv2_ref(x, mask, avg_ct, pq, pk, pv):
    b, c, w, h = x.shape
    wh = w * h
    qx, kx, vx = dsconv_ref(x, pq), dsconv_ref(x, pk), dsconv_ref(x, pv)
    qm, vavg = dsconv_ref(mask, pq), dsconv_ref(avg_ct, pv)

    def attn(q):
        qk = jnp.matmul(q.reshape(b, c, wh), kx.reshape(b, wh, c),
                        precision=lax.Precision.HIGHEST) / math.sqrt(wh)
        return jax.nn.softmax(qk.reshape(b, c * c), axis=1).reshape(b, c, c)

    a1, a3 = attn(qx), attn(qm)

    def app(a, v):
        return jnp.matmul(a, v.reshape(b, c, wh),
                          precision=lax.Precision.HIGHEST).reshape(b, c, w, h)

    return app(a1, vx) + app(a3, vx) + app(a1, vavg) + app(a3, vavg) + x


def make_dsconv_params(key, c):
    k1, k2, k3, k4 = jax.random.split(key, 4)
    bd_ = 1.0 / math.sqrt(1 * 3 * 3)
    bp_ = 1.0 / math.sqrt(c)
    wd = jax.random.uniform(k1, (c, 3, 3), jnp.float32, -bd_, bd_)
    bd = jax.random.uniform(k2, (c,), jnp.float32, -bd_, bd_)
    wp = jax.random.uniform(k3, (c, c), jnp.float32, -bp_, bp_)
    bp = jax.random.uniform(k4, (c,), jnp.float32, -bp_, bp_)
    return wd, bd, wp, bp


if __name__ == "__main__":
    b, c, w, h = 2, 4, 16, 16   # num_feat = 4

    key = jax.random.PRNGKey(0)
    kx_, km_, ka_, kp_ = jax.random.split(key, 4)
    x = jax.random.normal(kx_, (b, c, w, h), jnp.float32)
    mask = jax.random.normal(km_, (b, c, w, h), jnp.float32)
    avg_ct = jax.random.normal(ka_, (b, c, w, h), jnp.float32)

    kq, kk, kv = jax.random.split(kp_, 3)
    pq = make_dsconv_params(kq, c)
    pk = make_dsconv_params(kk, c)
    pv = make_dsconv_params(kv, c)

    out = fusionv2_forward(x, mask, avg_ct, pq, pk, pv)
    out = jax.block_until_ready(out)

    ref = fusionv2_ref(x, mask, avg_ct, pq, pk, pv)
    assert out.shape == (b, c, w, h)
    max_err = float(jnp.max(jnp.abs(out - ref)))
    assert max_err < 1e-3, f"mismatch vs reference: {max_err}"

    print("KERNEL_OK")
</pallas_src>

<mosaic_0001>
module attributes {stable_mosaic.version = 11 : i64} {
  func.func @_fusionv2_kernel(%arg0: i32, %arg1: memref<1x24x256xf32, #tpu.memory_space<vmem>>, %arg2: memref<9x32x24xf32, #tpu.memory_space<vmem>>, %arg3: memref<32x1xf32, #tpu.memory_space<vmem>>, %arg4: memref<9x256xf32, #tpu.memory_space<vmem>>, %arg5: memref<64x256xf32, #tpu.memory_space<vmem>>, %arg6: memref<256x4xf32, #tpu.memory_space<vmem>>, %arg7: memref<1x8x256xf32, #tpu.memory_space<vmem>>) attributes {dimension_semantics = [#tpu.dimension_semantics<parallel>], iteration_bounds = array<i64: 1>, scalar_prefetch = 0 : i64, scratch_operands = 0 : i64, tpu.core_type = #tpu.core_type<tc>, window_params = [{transform_indices = @transform_0, window_bounds = array<i64: 1, 24, 256>}, {pipeline_mode = #tpu.pipeline_mode<synchronous>, transform_indices = @transform_1, window_bounds = array<i64: 9, 32, 24>}, {pipeline_mode = #tpu.pipeline_mode<synchronous>, transform_indices = @transform_2, window_bounds = array<i64: 32, 1>}, {pipeline_mode = #tpu.pipeline_mode<synchronous>, transform_indices = @transform_3, window_bounds = array<i64: 9, 256>}, {pipeline_mode = #tpu.pipeline_mode<synchronous>, transform_indices = @transform_4, window_bounds = array<i64: 64, 256>}, {pipeline_mode = #tpu.pipeline_mode<synchronous>, transform_indices = @transform_5, window_bounds = array<i64: 256, 4>}, {transform_indices = @transform_6, window_bounds = array<i64: 1, 8, 256>}]} {
    %c0 = arith.constant 0 : index
    %c0_0 = arith.constant 0 : index
    %c0_1 = arith.constant 0 : index
    %0 = vector.load %arg1[%c0, %c0_0, %c0_1] : memref<1x24x256xf32, #tpu.memory_space<vmem>>, vector<1x24x256xf32>
    %1 = vector.shape_cast %0 : vector<1x24x256xf32> to vector<24x256xf32>
    %c4 = arith.constant 4 : index
    %c0_2 = arith.constant 0 : index
    %c0_3 = arith.constant 0 : index
    %2 = vector.load %arg2[%c4, %c0_2, %c0_3] : memref<9x32x24xf32, #tpu.memory_space<vmem>>, vector<1x32x24xf32>
    %3 = vector.shape_cast %2 : vector<1x32x24xf32> to vector<32x24xf32>
    %cst = arith.constant dense<0.000000e+00> : vector<32x256xf32>
    %4 = tpu.matmul %3, %1, %cst {dimension_numbers = #tpu.dot_dimension_numbers<[1], [0], [0], [1], [0, 0, 1, 1], [], []>} : vector<32x24xf32>, vector<24x256xf32>, vector<32x256xf32> -> vector<32x256xf32>
    %c0_4 = arith.constant 0 : index
    %c0_5 = arith.constant 0 : index
    %5 = vector.load %arg3[%c0_4, %c0_5] : memref<32x1xf32, #tpu.memory_space<vmem>>, vector<32x1xf32>
    %6 = vector.broadcast %5 : vector<32x1xf32> to vector<32x256xf32>
    %7 = arith.addf %4, %6 : vector<32x256xf32>
    %c17_i32 = arith.constant 17 : i32
    %8 = tpu.dynamic_rotate %1 by %c17_i32 dim 1 : vector<24x256xf32>, i32 -> vector<24x256xf32>
    %c0_6 = arith.constant 0 : index
    %c0_7 = arith.constant 0 : index
    %9 = vector.load %arg4[%c0_6, %c0_7] : memref<9x256xf32, #tpu.memory_space<vmem>>, vector<1x256xf32>
    %10 = vector.broadcast %9 : vector<1x256xf32> to vector<24x256xf32>
    %11 = arith.mulf %8, %10 : vector<24x256xf32>
    %c0_8 = arith.constant 0 : index
    %c0_9 = arith.constant 0 : index
    %c0_10 = arith.constant 0 : index
    %12 = vector.load %arg2[%c0_8, %c0_9, %c0_10] : memref<9x32x24xf32, #tpu.memory_space<vmem>>, vector<1x32x24xf32>
    %13 = vector.shape_cast %12 : vector<1x32x24xf32> to vector<32x24xf32>
    %cst_11 = arith.constant dense<0.000000e+00> : vector<32x256xf32>
    %14 = tpu.matmul %13, %11, %cst_11 {dimension_numbers = #tpu.dot_dimension_numbers<[1], [0], [0], [1], [0, 0, 1, 1], [], []>} : vector<32x24xf32>, vector<24x256xf32>, vector<32x256xf32> -> vector<32x256xf32>
    %15 = arith.addf %7, %14 : vector<32x256xf32>
    %c16_i32 = arith.constant 16 : i32
    %16 = tpu.dynamic_rotate %1 by %c16_i32 dim 1 : vector<24x256xf32>, i32 -> vector<24x256xf32>
    %c1 = arith.constant 1 : index
    %c0_12 = arith.constant 0 : index
    %17 = vector.load %arg4[%c1, %c0_12] : memref<9x256xf32, #tpu.memory_space<vmem>>, vector<1x256xf32>
    %18 = vector.broadcast %17 : vector<1x256xf32> to vector<24x256xf32>
    %19 = arith.mulf %16, %18 : vector<24x256xf32>
    %c1_13 = arith.constant 1 : index
    %c0_14 = arith.constant 0 : index
    %c0_15 = arith.constant 0 : index
    %20 = vector.load %arg2[%c1_13, %c0_14, %c0_15] : memref<9x32x24xf32, #tpu.memory_space<vmem>>, vector<1x32x24xf32>
    %21 = vector.shape_cast %20 : vector<1x32x24xf32> to vector<32x24xf32>
    %cst_16 = arith.constant dense<0.000000e+00> : vector<32x256xf32>
    %22 = tpu.matmul %21, %19, %cst_16 {dimension_numbers = #tpu.dot_dimension_numbers<[1], [0], [0], [1], [0, 0, 1, 1], [], []>} : vector<32x24xf32>, vector<24x256xf32>, vector<32x256xf32> -> vector<32x256xf32>
    %23 = arith.addf %15, %22 : vector<32x256xf32>
    %c15_i32 = arith.constant 15 : i32
    %24 = tpu.dynamic_rotate %1 by %c15_i32 dim 1 : vector<24x256xf32>, i32 -> vector<24x256xf32>
    %c2 = arith.constant 2 : index
    %c0_17 = arith.constant 0 : index
    %25 = vector.load %arg4[%c2, %c0_17] : memref<9x256xf32, #tpu.memory_space<vmem>>, vector<1x256xf32>
    %26 = vector.broadcast %25 : vector<1x256xf32> to vector<24x256xf32>
    %27 = arith.mulf %24, %26 : vector<24x256xf32>
    %c2_18 = arith.constant 2 : index
    %c0_19 = arith.constant 0 : index
    %c0_20 = arith.constant 0 : index
    %28 = vector.load %arg2[%c2_18, %c0_19, %c0_20] : memref<9x32x24xf32, #tpu.memory_space<vmem>>, vector<1x32x24xf32>
    %29 = vector.shape_cast %28 : vector<1x32x24xf32> to vector<32x24xf32>
    %cst_21 = arith.constant dense<0.000000e+00> : vector<32x256xf32>
    %30 = tpu.matmul %29, %27, %cst_21 {dimension_numbers = #tpu.dot_dimension_numbers<[1], [0], [0], [1], [0, 0, 1, 1], [], []>} : vector<32x24xf32>, vector<24x256xf32>, vector<32x256xf32> -> vector<32x256xf32>
    %31 = arith.addf %23, %30 : vector<32x256xf32>
    %c1_i32 = arith.constant 1 : i32
    %32 = tpu.dynamic_rotate %1 by %c1_i32 dim 1 : vector<24x256xf32>, i32 -> vector<24x256xf32>
    %c3 = arith.constant 3 : index
    %c0_22 = arith.constant 0 : index
    %33 = vector.load %arg4[%c3, %c0_22] : memref<9x256xf32, #tpu.memory_space<vmem>>, vector<1x256xf32>
    %34 = vector.broadcast %33 : vector<1x256xf32> to vector<24x256xf32>
    %35 = arith.mulf %32, %34 : vector<24x256xf32>
    %c3_23 = arith.constant 3 : index
    %c0_24 = arith.constant 0 : index
    %c0_25 = arith.constant 0 : index
    %36 = vector.load %arg2[%c3_23, %c0_24, %c0_25] : memref<9x32x24xf32, #tpu.memory_space<vmem>>, vector<1x32x24xf32>
    %37 = vector.shape_cast %36 : vector<1x32x24xf32> to vector<32x24xf32>
    %cst_26 = arith.constant dense<0.000000e+00> : vector<32x256xf32>
    %38 = tpu.matmul %37, %35, %cst_26 {dimension_numbers = #tpu.dot_dimension_numbers<[1], [0], [0], [1], [0, 0, 1, 1], [], []>} : vector<32x24xf32>, vector<24x256xf32>, vector<32x256xf32> -> vector<32x256xf32>
    %39 = arith.addf %31, %38 : vector<32x256xf32>
    %c255_i32 = arith.constant 255 : i32
    %40 = tpu.dynamic_rotate %1 by %c255_i32 dim 1 : vector<24x256xf32>, i32 -> vector<24x256xf32>
    %c5 = arith.constant 5 : index
    %c0_27 = arith.constant 0 : index
    %41 = vector.load %arg4[%c5, %c0_27] : memref<9x256xf32, #tpu.memory_space<vmem>>, vector<1x256xf32>
    %42 = vector.broadcast %41 : vector<1x256xf32> to vector<24x256xf32>
    %43 = arith.mulf %40, %42 : vector<24x256xf32>
    %c5_28 = arith.constant 5 : index
    %c0_29 = arith.constant 0 : index
    %c0_30 = arith.constant 0 : index
    %44 = vector.load %arg2[%c5_28, %c0_29, %c0_30] : memref<9x32x24xf32, #tpu.memory_space<vmem>>, vector<1x32x24xf32>
    %45 = vector.shape_cast %44 : vector<1x32x24xf32> to vector<32x24xf32>
    %cst_31 = arith.constant dense<0.000000e+00> : vector<32x256xf32>
    %46 = tpu.matmul %45, %43, %cst_31 {dimension_numbers = #tpu.dot_dimension_numbers<[1], [0], [0], [1], [0, 0, 1, 1], [], []>} : vector<32x24xf32>, vector<24x256xf32>, vector<32x256xf32> -> vector<32x256xf32>
    %47 = arith.addf %39, %46 : vector<32x256xf32>
    %c241_i32 = arith.constant 241 : i32
    %48 = tpu.dynamic_rotate %1 by %c241_i32 dim 1 : vector<24x256xf32>, i32 -> vector<24x256xf32>
    %c6 = arith.constant 6 : index
    %c0_32 = arith.constant 0 : index
    %49 = vector.load %arg4[%c6, %c0_32] : memref<9x256xf32, #tpu.memory_space<vmem>>, vector<1x256xf32>
    %50 = vector.broadcast %49 : vector<1x256xf32> to vector<24x256xf32>
    %51 = arith.mulf %48, %50 : vector<24x256xf32>
    %c6_33 = arith.constant 6 : index
    %c0_34 = arith.constant 0 : index
    %c0_35 = arith.constant 0 : index
    %52 = vector.load %arg2[%c6_33, %c0_34, %c0_35] : memref<9x32x24xf32, #tpu.memory_space<vmem>>, vector<1x32x24xf32>
    %53 = vector.shape_cast %52 : vector<1x32x24xf32> to vector<32x24xf32>
    %cst_36 = arith.constant dense<0.000000e+00> : vector<32x256xf32>
    %54 = tpu.matmul %53, %51, %cst_36 {dimension_numbers = #tpu.dot_dimension_numbers<[1], [0], [0], [1], [0, 0, 1, 1], [], []>} : vector<32x24xf32>, vector<24x256xf32>, vector<32x256xf32> -> vector<32x256xf32>
    %55 = arith.addf %47, %54 : vector<32x256xf32>
    %c240_i32 = arith.constant 240 : i32
    %56 = tpu.dynamic_rotate %1 by %c240_i32 dim 1 : vector<24x256xf32>, i32 -> vector<24x256xf32>
    %c7 = arith.constant 7 : index
    %c0_37 = arith.constant 0 : index
    %57 = vector.load %arg4[%c7, %c0_37] : memref<9x256xf32, #tpu.memory_space<vmem>>, vector<1x256xf32>
    %58 = vector.broadcast %57 : vector<1x256xf32> to vector<24x256xf32>
    %59 = arith.mulf %56, %58 : vector<24x256xf32>
    %c7_38 = arith.constant 7 : index
    %c0_39 = arith.constant 0 : index
    %c0_40 = arith.constant 0 : index
    %60 = vector.load %arg2[%c7_38, %c0_39, %c0_40] : memref<9x32x24xf32, #tpu.memory_space<vmem>>, vector<1x32x24xf32>
    %61 = vector.shape_cast %60 : vector<1x32x24xf32> to vector<32x24xf32>
    %cst_41 = arith.constant dense<0.000000e+00> : vector<32x256xf32>
    %62 = tpu.matmul %61, %59, %cst_41 {dimension_numbers = #tpu.dot_dimension_numbers<[1], [0], [0], [1], [0, 0, 1, 1], [], []>} : vector<32x24xf32>, vector<24x256xf32>, vector<32x256xf32> -> vector<32x256xf32>
    %63 = arith.addf %55, %62 : vector<32x256xf32>
    %c239_i32 = arith.constant 239 : i32
    %64 = tpu.dynamic_rotate %1 by %c239_i32 dim 1 : vector<24x256xf32>, i32 -> vector<24x256xf32>
    %c8 = arith.constant 8 : index
    %c0_42 = arith.constant 0 : index
    %65 = vector.load %arg4[%c8, %c0_42] : memref<9x256xf32, #tpu.memory_space<vmem>>, vector<1x256xf32>
    %66 = vector.broadcast %65 : vector<1x256xf32> to vector<24x256xf32>
    %67 = arith.mulf %64, %66 : vector<24x256xf32>
    %c8_43 = arith.constant 8 : index
    %c0_44 = arith.constant 0 : index
    %c0_45 = arith.constant 0 : index
    %68 = vector.load %arg2[%c8_43, %c0_44, %c0_45] : memref<9x32x24xf32, #tpu.memory_space<vmem>>, vector<1x32x24xf32>
    %69 = vector.shape_cast %68 : vector<1x32x24xf32> to vector<32x24xf32>
    %cst_46 = arith.constant dense<0.000000e+00> : vector<32x256xf32>
    %70 = tpu.matmul %69, %67, %cst_46 {dimension_numbers = #tpu.dot_dimension_numbers<[1], [0], [0], [1], [0, 0, 1, 1], [], []>} : vector<32x24xf32>, vector<24x256xf32>, vector<32x256xf32> -> vector<32x256xf32>
    %71 = arith.addf %63, %70 : vector<32x256xf32>
    %c0_47 = arith.constant 0 : index
    %c0_48 = arith.constant 0 : index
    %72 = vector.load %arg5[%c0_47, %c0_48] : memref<64x256xf32, #tpu.memory_space<vmem>>, vector<64x256xf32>
    %73 = vector.extract_strided_slice %71 {offsets = [0, 0], sizes = [16, 256], strides = [1, 1]} : vector<32x256xf32> to vector<16x256xf32>
    %74 = vector.extract_strided_slice %73 {offsets = [0, 0], sizes = [16, 64], strides = [1, 1]} : vector<16x256xf32> to vector<16x64xf32>
    %cst_49 = arith.constant dense<0.000000e+00> : vector<16x256xf32>
    %75 = tpu.matmul %74, %72, %cst_49 {dimension_numbers = #tpu.dot_dimension_numbers<[1], [0], [0], [1], [0, 0, 1, 1], [], []>} : vector<16x64xf32>, vector<64x256xf32>, vector<16x256xf32> -> vector<16x256xf32>
    %76 = vector.extract_strided_slice %71 {offsets = [16, 0], sizes = [1, 256], strides = [1, 1]} : vector<32x256xf32> to vector<1x256xf32>
    %77 = vector.extract_strided_slice %71 {offsets = [20, 0], sizes = [1, 256], strides = [1, 1]} : vector<32x256xf32> to vector<1x256xf32>
    %78 = vector.extract_strided_slice %75 {offsets = [0, 0], sizes = [8, 256], strides = [1, 1]} : vector<16x256xf32> to vector<8x256xf32>
    %79 = vector.broadcast %76 : vector<1x256xf32> to vector<8x256xf32>
    %80 = arith.mulf %78, %79 : vector<8x256xf32>
    %81 = vector.extract_strided_slice %75 {offsets = [8, 0], sizes = [8, 256], strides = [1, 1]} : vector<16x256xf32> to vector<8x256xf32>
    %82 = vector.broadcast %77 : vector<1x256xf32> to vector<8x256xf32>
    %83 = arith.mulf %81, %82 : vector<8x256xf32>
    %84 = tpu.concatenate %80, %83 in 0 : vector<8x256xf32>, vector<8x256xf32> -> vector<16x256xf32>
    %85 = vector.extract_strided_slice %73 {offsets = [0, 64], sizes = [16, 64], strides = [1, 1]} : vector<16x256xf32> to vector<16x64xf32>
    %cst_50 = arith.constant dense<0.000000e+00> : vector<16x256xf32>
    %86 = tpu.matmul %85, %72, %cst_50 {dimension_numbers = #tpu.dot_dimension_numbers<[1], [0], [0], [1], [0, 0, 1, 1], [], []>} : vector<16x64xf32>, vector<64x256xf32>, vector<16x256xf32> -> vector<16x256xf32>
    %87 = vector.extract_strided_slice %71 {offsets = [17, 0], sizes = [1, 256], strides = [1, 1]} : vector<32x256xf32> to vector<1x256xf32>
    %88 = vector.extract_strided_slice %71 {offsets = [21, 0], sizes = [1, 256], strides = [1, 1]} : vector<32x256xf32> to vector<1x256xf32>
    %89 = vector.extract_strided_slice %86 {offsets = [0, 0], sizes = [8, 256], strides = [1, 1]} : vector<16x256xf32> to vector<8x256xf32>
    %90 = vector.broadcast %87 : vector<1x256xf32> to vector<8x256xf32>
    %91 = arith.mulf %89, %90 : vector<8x256xf32>
    %92 = vector.extract_strided_slice %86 {offsets = [8, 0], sizes = [8, 256], strides = [1, 1]} : vector<16x256xf32> to vector<8x256xf32>
    %93 = vector.broadcast %88 : vector<1x256xf32> to vector<8x256xf32>
    %94 = arith.mulf %92, %93 : vector<8x256xf32>
    %95 = tpu.concatenate %91, %94 in 0 : vector<8x256xf32>, vector<8x256xf32> -> vector<16x256xf32>
    %96 = arith.addf %84, %95 : vector<16x256xf32>
    %97 = vector.extract_strided_slice %73 {offsets = [0, 128], sizes = [16, 64], strides = [1, 1]} : vector<16x256xf32> to vector<16x64xf32>
    %cst_51 = arith.constant dense<0.000000e+00> : vector<16x256xf32>
    %98 = tpu.matmul %97, %72, %cst_51 {dimension_numbers = #tpu.dot_dimension_numbers<[1], [0], [0], [1], [0, 0, 1, 1], [], []>} : vector<16x64xf32>, vector<64x256xf32>, vector<16x256xf32> -> vector<16x256xf32>
    %99 = vector.extract_strided_slice %71 {offsets = [18, 0], sizes = [1, 256], strides = [1, 1]} : vector<32x256xf32> to vector<1x256xf32>
    %100 = vector.extract_strided_slice %71 {offsets = [22, 0], sizes = [1, 256], strides = [1, 1]} : vector<32x256xf32> to vector<1x256xf32>
    %101 = vector.extract_strided_slice %98 {offsets = [0, 0], sizes = [8, 256], strides = [1, 1]} : vector<16x256xf32> to vector<8x256xf32>
    %102 = vector.broadcast %99 : vector<1x256xf32> to vector<8x256xf32>
    %103 = arith.mulf %101, %102 : vector<8x256xf32>
    %104 = vector.extract_strided_slice %98 {offsets = [8, 0], sizes = [8, 256], strides = [1, 1]} : vector<16x256xf32> to vector<8x256xf32>
    %105 = vector.broadcast %100 : vector<1x256xf32> to vector<8x256xf32>
    %106 = arith.mulf %104, %105 : vector<8x256xf32>
    %107 = tpu.concatenate %103, %106 in 0 : vector<8x256xf32>, vector<8x256xf32> -> vector<16x256xf32>
    %108 = arith.addf %96, %107 : vector<16x256xf32>
    %109 = vector.extract_strided_slice %73 {offsets = [0, 192], sizes = [16, 64], strides = [1, 1]} : vector<16x256xf32> to vector<16x64xf32>
    %cst_52 = arith.constant dense<0.000000e+00> : vector<16x256xf32>
    %110 = tpu.matmul %109, %72, %cst_52 {dimension_numbers = #tpu.dot_dimension_numbers<[1], [0], [0], [1], [0, 0, 1, 1], [], []>} : vector<16x64xf32>, vector<64x256xf32>, vector<16x256xf32> -> vector<16x256xf32>
    %111 = vector.extract_strided_slice %71 {offsets = [19, 0], sizes = [1, 256], strides = [1, 1]} : vector<32x256xf32> to vector<1x256xf32>
    %112 = vector.extract_strided_slice %71 {offsets = [23, 0], sizes = [1, 256], strides = [1, 1]} : vector<32x256xf32> to vector<1x256xf32>
    %113 = vector.extract_strided_slice %110 {offsets = [0, 0], sizes = [8, 256], strides = [1, 1]} : vector<16x256xf32> to vector<8x256xf32>
    %114 = vector.broadcast %111 : vector<1x256xf32> to vector<8x256xf32>
    %115 = arith.mulf %113, %114 : vector<8x256xf32>
    %116 = vector.extract_strided_slice %110 {offsets = [8, 0], sizes = [8, 256], strides = [1, 1]} : vector<16x256xf32> to vector<8x256xf32>
    %117 = vector.broadcast %112 : vector<1x256xf32> to vector<8x256xf32>
    %118 = arith.mulf %116, %117 : vector<8x256xf32>
    %119 = tpu.concatenate %115, %118 in 0 : vector<8x256xf32>, vector<8x256xf32> -> vector<16x256xf32>
    %120 = arith.addf %108, %119 : vector<16x256xf32>
    %c0_53 = arith.constant 0 : index
    %c0_54 = arith.constant 0 : index
    %121 = vector.load %arg6[%c0_53, %c0_54] : memref<256x4xf32, #tpu.memory_space<vmem>>, vector<256x4xf32>
    %cst_55 = arith.constant dense<0.000000e+00> : vector<16x4xf32>
    %122 = tpu.matmul %120, %121, %cst_55 {dimension_numbers = #tpu.dot_dimension_numbers<[1], [0], [0], [1], [0, 0, 1, 1], [], []>} : vector<16x256xf32>, vector<256x4xf32>, vector<16x4xf32> -> vector<16x4xf32>
    %123 = vector.extract_strided_slice %122 {offsets = [0, 0], sizes = [4, 4], strides = [1, 1]} : vector<16x4xf32> to vector<4x4xf32>
    %cst_56 = arith.constant dense<0xFF800000> : vector<4xf32>
    %124 = vector.multi_reduction <maximumf>, %123, %cst_56 [1] : vector<4x4xf32> to vector<4xf32>
    %125 = vector.shape_cast %124 : vector<4xf32> to vector<4x1xf32>
    %cst_57 = arith.constant dense<0xFF800000> : vector<1xf32>
    %126 = vector.multi_reduction <maximumf>, %125, %cst_57 [0] : vector<4x1xf32> to vector<1xf32>
    %127 = vector.shape_cast %126 : vector<1xf32> to vector<1x1xf32>
    %128 = vector.broadcast %127 : vector<1x1xf32> to vector<4x4xf32>
    %129 = arith.subf %123, %128 : vector<4x4xf32>
    %130 = math.exp %129 : vector<4x4xf32>
    %cst_58 = arith.constant dense<0.000000e+00> : vector<4xf32>
    %131 = vector.multi_reduction <add>, %130, %cst_58 [1] : vector<4x4xf32> to vector<4xf32>
    %132 = vector.shape_cast %131 : vector<4xf32> to vector<4x1xf32>
    %cst_59 = arith.constant dense<0.000000e+00> : vector<1xf32>
    %133 = vector.multi_reduction <add>, %132, %cst_59 [0] : vector<4x1xf32> to vector<1xf32>
    %134 = vector.shape_cast %133 : vector<1xf32> to vector<1x1xf32>
    %135 = tpu.reciprocal %134 {approx = true} : vector<1x1xf32> -> vector<1x1xf32>
    %136 = vector.broadcast %135 : vector<1x1xf32> to vector<4x4xf32>
    %137 = arith.mulf %130, %136 : vector<4x4xf32>
    %138 = vector.extract_strided_slice %122 {offsets = [4, 0], sizes = [4, 4], strides = [1, 1]} : vector<16x4xf32> to vector<4x4xf32>
    %cst_60 = arith.constant dense<0xFF800000> : vector<4xf32>
    %139 = vector.multi_reduction <maximumf>, %138, %cst_60 [1] : vector<4x4xf32> to vector<4xf32>
    %140 = vector.shape_cast %139 : vector<4xf32> to vector<4x1xf32>
    %cst_61 = arith.constant dense<0xFF800000> : vector<1xf32>
    %141 = vector.multi_reduction <maximumf>, %140, %cst_61 [0] : vector<4x1xf32> to vector<1xf32>
    %142 = vector.shape_cast %141 : vector<1xf32> to vector<1x1xf32>
    %143 = vector.broadcast %142 : vector<1x1xf32> to vector<4x4xf32>
    %144 = arith.subf %138, %143 : vector<4x4xf32>
    %145 = math.exp %144 : vector<4x4xf32>
    %cst_62 = arith.constant dense<0.000000e+00> : vector<4xf32>
    %146 = vector.multi_reduction <add>, %145, %cst_62 [1] : vector<4x4xf32> to vector<4xf32>
    %147 = vector.shape_cast %146 : vector<4xf32> to vector<4x1xf32>
    %cst_63 = arith.constant dense<0.000000e+00> : vector<1xf32>
    %148 = vector.multi_reduction <add>, %147, %cst_63 [0] : vector<4x1xf32> to vector<1xf32>
    %149 = vector.shape_cast %148 : vector<1xf32> to vector<1x1xf32>
    %150 = tpu.reciprocal %149 {approx = true} : vector<1x1xf32> -> vector<1x1xf32>
    %151 = vector.broadcast %150 : vector<1x1xf32> to vector<4x4xf32>
    %152 = arith.mulf %145, %151 : vector<4x4xf32>
    %153 = arith.addf %137, %152 : vector<4x4xf32>
    %154 = vector.extract_strided_slice %122 {offsets = [8, 0], sizes = [4, 4], strides = [1, 1]} : vector<16x4xf32> to vector<4x4xf32>
    %cst_64 = arith.constant dense<0xFF800000> : vector<4xf32>
    %155 = vector.multi_reduction <maximumf>, %154, %cst_64 [1] : vector<4x4xf32> to vector<4xf32>
    %156 = vector.shape_cast %155 : vector<4xf32> to vector<4x1xf32>
    %cst_65 = arith.constant dense<0xFF800000> : vector<1xf32>
    %157 = vector.multi_reduction <maximumf>, %156, %cst_65 [0] : vector<4x1xf32> to vector<1xf32>
    %158 = vector.shape_cast %157 : vector<1xf32> to vector<1x1xf32>
    %159 = vector.broadcast %158 : vector<1x1xf32> to vector<4x4xf32>
    %160 = arith.subf %154, %159 : vector<4x4xf32>
    %161 = math.exp %160 : vector<4x4xf32>
    %cst_66 = arith.constant dense<0.000000e+00> : vector<4xf32>
    %162 = vector.multi_reduction <add>, %161, %cst_66 [1] : vector<4x4xf32> to vector<4xf32>
    %163 = vector.shape_cast %162 : vector<4xf32> to vector<4x1xf32>
    %cst_67 = arith.constant dense<0.000000e+00> : vector<1xf32>
    %164 = vector.multi_reduction <add>, %163, %cst_67 [0] : vector<4x1xf32> to vector<1xf32>
    %165 = vector.shape_cast %164 : vector<1xf32> to vector<1x1xf32>
    %166 = tpu.reciprocal %165 {approx = true} : vector<1x1xf32> -> vector<1x1xf32>
    %167 = vector.broadcast %166 : vector<1x1xf32> to vector<4x4xf32>
    %168 = arith.mulf %161, %167 : vector<4x4xf32>
    %169 = vector.extract_strided_slice %122 {offsets = [12, 0], sizes = [4, 4], strides = [1, 1]} : vector<16x4xf32> to vector<4x4xf32>
    %cst_68 = arith.constant dense<0xFF800000> : vector<4xf32>
    %170 = vector.multi_reduction <maximumf>, %169, %cst_68 [1] : vector<4x4xf32> to vector<4xf32>
    %171 = vector.shape_cast %170 : vector<4xf32> to vector<4x1xf32>
    %cst_69 = arith.constant dense<0xFF800000> : vector<1xf32>
    %172 = vector.multi_reduction <maximumf>, %171, %cst_69 [0] : vector<4x1xf32> to vector<1xf32>
    %173 = vector.shape_cast %172 : vector<1xf32> to vector<1x1xf32>
    %174 = vector.broadcast %173 : vector<1x1xf32> to vector<4x4xf32>
    %175 = arith.subf %169, %174 : vector<4x4xf32>
    %176 = math.exp %175 : vector<4x4xf32>
    %cst_70 = arith.constant dense<0.000000e+00> : vector<4xf32>
    %177 = vector.multi_reduction <add>, %176, %cst_70 [1] : vector<4x4xf32> to vector<4xf32>
    %178 = vector.shape_cast %177 : vector<4xf32> to vector<4x1xf32>
    %cst_71 = arith.constant dense<0.000000e+00> : vector<1xf32>
    %179 = vector.multi_reduction <add>, %178, %cst_71 [0] : vector<4x1xf32> to vector<1xf32>
    %180 = vector.shape_cast %179 : vector<1xf32> to vector<1x1xf32>
    %181 = tpu.reciprocal %180 {approx = true} : vector<1x1xf32> -> vector<1x1xf32>
    %182 = vector.broadcast %181 : vector<1x1xf32> to vector<4x4xf32>
    %183 = arith.mulf %176, %182 : vector<4x4xf32>
    %184 = arith.addf %168, %183 : vector<4x4xf32>
    %cst_72 = arith.constant 0.000000e+00 : f32
    %185 = vector.broadcast %cst_72 : f32 to vector<4x4xf32>
    %186 = tpu.concatenate %153, %185 in 1 : vector<4x4xf32>, vector<4x4xf32> -> vector<4x8xf32>
    %187 = tpu.concatenate %185, %184 in 1 : vector<4x4xf32>, vector<4x4xf32> -> vector<4x8xf32>
    %188 = tpu.concatenate %186, %187 in 0 : vector<4x8xf32>, vector<4x8xf32> -> vector<8x8xf32>
    %189 = vector.extract_strided_slice %71 {offsets = [24, 0], sizes = [8, 256], strides = [1, 1]} : vector<32x256xf32> to vector<8x256xf32>
    %190 = vector.extract_strided_slice %1 {offsets = [0, 0], sizes = [8, 256], strides = [1, 1]} : vector<24x256xf32> to vector<8x256xf32>
    %cst_73 = arith.constant dense<0.000000e+00> : vector<8x256xf32>
    %191 = tpu.matmul %188, %189, %cst_73 {dimension_numbers = #tpu.dot_dimension_numbers<[1], [0], [0], [1], [0, 0, 1, 1], [], []>} : vector<8x8xf32>, vector<8x256xf32>, vector<8x256xf32> -> vector<8x256xf32>
    %192 = arith.addf %191, %190 : vector<8x256xf32>
    %c0_74 = arith.constant 0 : index
    %c0_75 = arith.constant 0 : index
    %c0_76 = arith.constant 0 : index
    %193 = vector.load %arg7[%c0_74, %c0_75, %c0_76] : memref<1x8x256xf32, #tpu.memory_space<vmem>>, vector<1x8x256xf32>
    %194 = vector.shape_cast %193 : vector<1x8x256xf32> to vector<8x256xf32>
    %195 = vector.shape_cast %192 : vector<8x256xf32> to vector<1x8x256xf32>
    tpu.vector_store %arg7[%c0_74, %c0_75, %c0_76], %195 {strides = array<i32>} : memref<1x8x256xf32, #tpu.memory_space<vmem>>, vector<1x8x256xf32>,
    return
  }
  func.func @transform_0(%arg0: i32) -> (i32, i32, i32) {
    %c0_i32 = arith.constant 0 : i32
    %c0_i32_0 = arith.constant 0 : i32
    %c0_i32_1 = arith.constant 0 : i32
    return %arg0, %c0_i32, %c0_i32_0 : i32, i32, i32
  }
  func.func @transform_1(%arg0: i32) -> (i32, i32, i32) {
    %c0_i32 = arith.constant 0 : i32
    %c0_i32_0 = arith.constant 0 : i32
    %c0_i32_1 = arith.constant 0 : i32
    %c0_i32_2 = arith.constant 0 : i32
    return %c0_i32, %c0_i32_0, %c0_i32_1 : i32, i32, i32
  }
  func.func @transform_2(%arg0: i32) -> (i32, i32) {
    %c0_i32 = arith.constant 0 : i32
    %c0_i32_0 = arith.constant 0 : i32
    %c0_i32_1 = arith.constant 0 : i32
    return %c0_i32, %c0_i32_0 : i32, i32
  }
  func.func @transform_3(%arg0: i32) -> (i32, i32) {
    %c0_i32 = arith.constant 0 : i32
    %c0_i32_0 = arith.constant 0 : i32
    %c0_i32_1 = arith.constant 0 : i32
    return %c0_i32, %c0_i32_0 : i32, i32
  }
  func.func @transform_4(%arg0: i32) -> (i32, i32) {
    %c0_i32 = arith.constant 0 : i32
    %c0_i32_0 = arith.constant 0 : i32
    %c0_i32_1 = arith.constant 0 : i32
    return %c0_i32, %c0_i32_0 : i32, i32
  }
  func.func @transform_5(%arg0: i32) -> (i32, i32) {
    %c0_i32 = arith.constant 0 : i32
    %c0_i32_0 = arith.constant 0 : i32
    %c0_i32_1 = arith.constant 0 : i32
    return %c0_i32, %c0_i32_0 : i32, i32
  }
  func.func @transform_6(%arg0: i32) -> (i32, i32, i32) {
    %c0_i32 = arith.constant 0 : i32
    %c0_i32_0 = arith.constant 0 : i32
    %c0_i32_1 = arith.constant 0 : i32
    return %arg0, %c0_i32, %c0_i32_0 : i32, i32, i32
  }
}

</mosaic_0001>

<bundles_post_ra>
// kernel: tpu_custom_call.1
= control target key start
LH: loop header
LB: loop body
LE: loop exit
PB: predicated region body
PF: predicated region fallthrough
CT: control target
= control target key end

     0   :  { %s1785_s25 = smov 17   ;;  %s2676_s0 = inlined_call_operand.vmem [shape: f32[1,24,256], index: 0, kind: input, shape index: {}]   ;;  %s2677_s1 = inlined_call_operand.vmem [shape: f32[9,32,24], index: 1, kind: input, shape index: {}]   ;;  %s2678_s2 = inlined_call_operand.vmem [shape: f32[32,1], index: 2, kind: input, shape index: {}]   ;;  %s2679_s3 = inlined_call_operand.vmem [shape: f32[9,256], index: 3, kind: input, shape index: {}]   ;;  %s2680_s4 = inlined_call_operand.vmem [shape: f32[64,256], index: 4, kind: input, shape index: {}]   ;;  %s2681_s5 = inlined_call_operand.vmem [shape: f32[256,4], index: 5, kind: input, shape index: {}]   ;;  %s2682_s6 = inlined_call_operand.hbm [shape: f32[1,8,256], index: 6, kind: output, shape index: {}]  }
   0x1   :  { %v1835_v0 = vld [vmem:[%s2676_s0 + $0x20] sm:$0xff]  ;;  %v1840_v1 = vld [vmem:[%s2676_s0 + $0x10] sm:$0xff]  ;;  %v1852_v3 = vld [vmem:[%s2676_s0 + $0x28] sm:$0xff] }
   0x2   :  { %134 = vrot.lane.b32.xlu0 %v1835_v0, %s1785_s25  ;;  %132 = vrot.lane.b32.xlu1 %v1840_v1, %s1785_s25  ;;  %v1847_v2 = vld [vmem:[%s2676_s0] sm:$0xff] }
   0x3   :  { %130 = vrot.lane.b32.xlu2 %v1847_v2, %s1785_s25  ;;  %85 = vmatpush.msra.mxu0 %v1835_v0 }
   0x4   :  { %11 = vsyncpa [#allocation3], 0  ;;  %114 = vmatpush.msra.mxu1 %v1852_v3  ;;  %1721 = vmatpush.msra.mxu2 %v1835_v0  ;;  %v1861_v4 = vld [vmem:[%s2676_s0 + $0x18] sm:$0xff]  ;;  %v1870_v5 = vld [vmem:[%s2676_s0 + $0x8] sm:$0xff]  ;;  %s1786_s10 = smov 16   ;;  %s1787_s11 = smov 15   ;;  %v142_v16 = vlaneseq }
   0x5   :  { %86 = vmatpush.msra.mxu0 %v1840_v1  ;;  %1724 = vmatpush.msra.mxu3 %v1852_v3  ;;  %s1788_s12 = smov 1   ;;  %s1789_s13 = smov 127   ;;  %v1592_v6 = vld [vmem:[%s2677_s1 + $0x80] sm:$0xff]  ;;  %vm59_vm0 = vcmask 195584   ;;  %v1595_v7 = vld [vmem:[%s2677_s1 + $0x98] sm:$0xff]  ;;  %v1593_v9 = vld [vmem:[%s2677_s1 + $0x88] sm:$0xff] }
   0x6   :  { %115 = vmatpush.msra.mxu1 %v1861_v4  ;;  %1722 = vmatpush.msra.mxu2 %v1840_v1  ;;  %s1790_s14 = smov 113   ;;  %s1791_s19 = smov 112   ;;  %v1792_v11 = vmov 0   ;;  %v1594_v12 = vld [vmem:[%s2677_s1 + $0x90] sm:$0xff]  ;;  %v1941_v18 = vand.u32 127, %v142_v16  ;;  %v35_v36 = vld [vmem:[%s2678_s2] sm:$0xff] }
   0x7   :  { %1725 = vmatpush.msra.mxu3 %v1861_v4  ;;  %87 = vmatpush.msra.mxu0 %v1847_v2  ;;  %s1793_s24 = smov 111   ;;  %v151_v19 = vld [vmem:[%s2679_s3] ss:$8 sm:$0x3]  ;;  %vm1066_vm9 = vcmask 523264   ;;  %vm1428_vm10 = vcmask 31748  }
   0x8   :  { %116 = vmatpush.msra.mxu1 %v1870_v5  ;;  %1723 = vmatpush.msra.mxu2 %v1847_v2  ;;  %vm144_vm1 = vcmp.lt.s32.totalorder %v1941_v18, 17  ;;  %v153_v22 = vperm.slane %v151_v19, 0  ;;  %v154_v23 = vperm.slane %v151_v19, 1  ;;  %v1612_v33 = vld [vmem:[%s2679_s3 + $0x1] ss:$8 sm:$0x3] }
   0x9   :  { %1726 = vmatpush.msra.mxu3 %v1870_v5  ;;  %1596 = vmatmul.msk.f32.vlgmr.msra.gmra.mxu0 %vm59_vm0, %v1592_v6  ;;  %v36_v37 = vld [vmem:[%s2678_s2 + $0x8] sm:$0xff]  ;;  %vm257_vm2 = vcmp.lt.s32.totalorder %v1941_v18, 16  ;;  %v163_v40 = vld [vmem:[%s2677_s1] sm:$0xff]  ;;  %v267_v41 = vperm.slane %v1612_v33, 0  ;;  %v268_v42 = vperm.slane %v1612_v33, 1  ;;  %vm372_vm3 = vcmp.lt.s32.totalorder %v1941_v18, 15 }
   0xa   :  { %140 = vrot.lane.b32.xlu0 %v1852_v3, %s1785_s25  ;;  %138 = vrot.lane.b32.xlu1 %v1861_v4, %s1785_s25  ;;  %v164_v50 = vld [vmem:[%s2677_s1 + $0x8] sm:$0xff]  ;;  %v1613_v63 = vld [vmem:[%s2677_s1 + $0x20] sm:$0xff]  ;;  %vm487_vm4 = vcmp.lt.s32.totalorder %v1941_v18, 1  ;;  %vm602_vm5 = vcmp.lt.s32.totalorder %v1941_v18, 127  ;;  %vm717_vm6 = vcmp.lt.s32.totalorder %v1941_v18, 113  ;;  %vm832_vm7 = vcmp.lt.s32.totalorder %v1941_v18, 112 }
   0xb   :  { %136 = vrot.lane.b32.xlu2 %v1870_v5, %s1785_s25  ;;  %1600 = vmatmul.msk.f32.vlgmr.msra.gmra.mxu1 %vm59_vm0, %v1592_v6  ;;  %v1625_v61 = vld [vmem:[%s2679_s3 + $0x2] ss:$8 sm:$0x3]  ;;  %vm947_vm8 = vcmp.lt.s32.totalorder %v1941_v18, 111  ;;  %vm1401_vm11 = vcmask 27648   ;;  %vm1432_vm12 = vcmask 1047556  }
   0xc   :  { %1599 = vmatmul.msk.f32.vlgmr.msra.gmra.mxu2 %vm59_vm0, %v1595_v7  ;;  %1603 = vmatmul.msk.f32.vlgmr.msra.gmra.mxu3 %vm59_vm0, %v1595_v7  ;;  %vm1405_vm13 = vcmask 1043456   ;;  %vm1519_vm14 = vcmask 31744   ;;  %vm1530_vm15 = vcmask 64512   ;;  %s1796_s30 = smov [#allocation2]   ;;  %s1583_s9 = sshll.u32 %s2682_s6, 4  ;;  %s1584_s9 = int_to_ptr.hbm [resolvable:$true] %s1583_s9 }
   0xd   :  { %1739 = vset.pattern.permute.xlu0 %v1792_v11  ;;  %1740 = vset.pattern.permute.xlu1 %v1792_v11  ;;  %v166_v11 = vld [vmem:[%s2677_s1 + $0x18] sm:$0xff] }
  0x11   :  { %1597 = vmatmul.msk.f32.gmra.mxu0 %vm59_vm0, %v1593_v9 }
  0x12   :  { %249 = vrot.lane.b32.xlu0 %v1835_v0, %s1786_s10  ;;  %255 = vrot.lane.b32.xlu1 %v1852_v3, %s1786_s10 }
  0x13   :  { %247 = vrot.lane.b32.xlu2 %v1840_v1, %s1786_s10  ;;  %1601 = vmatmul.msk.f32.gmra.mxu1 %vm59_vm0, %v1593_v9  ;;  %v1614_v9 = vld [vmem:[%s2677_s1 + $0x28] sm:$0xff] }
  0x19   :  { %1598 = vmatmul.msk.f32.gmra.mxu0 %vm59_vm0, %v1594_v12 }
  0x1a   :  { %253 = vrot.lane.b32.xlu0 %v1861_v4, %s1786_s10  ;;  %245 = vrot.lane.b32.xlu1 %v1847_v2, %s1786_s10 }
  0x1b   :  { %251 = vrot.lane.b32.xlu2 %v1870_v5, %s1786_s10  ;;  %1602 = vmatmul.msk.f32.gmra.mxu1 %vm59_vm0, %v1594_v12 }
  0x22   :  { %364 = vrot.lane.b32.xlu0 %v1835_v0, %s1787_s11  ;;  %370 = vrot.lane.b32.xlu1 %v1852_v3, %s1787_s11 }
  0x23   :  { %362 = vrot.lane.b32.xlu2 %v1840_v1, %s1787_s11 }
  0x2a   :  { %368 = vrot.lane.b32.xlu0 %v1861_v4, %s1787_s11  ;;  %360 = vrot.lane.b32.xlu1 %v1847_v2, %s1787_s11 }
  0x2b   :  { %366 = vrot.lane.b32.xlu2 %v1870_v5, %s1787_s11 }
  0x32   :  { %479 = vrot.lane.b32.xlu0 %v1835_v0, %s1788_s12  ;;  %485 = vrot.lane.b32.xlu1 %v1852_v3, %s1788_s12 }
  0x33   :  { %477 = vrot.lane.b32.xlu2 %v1840_v1, %s1788_s12 }
  0x3a   :  { %483 = vrot.lane.b32.xlu0 %v1861_v4, %s1788_s12  ;;  %475 = vrot.lane.b32.xlu1 %v1847_v2, %s1788_s12 }
  0x3b   :  { %481 = vrot.lane.b32.xlu2 %v1870_v5, %s1788_s12 }
  0x42   :  { %594 = vrot.lane.b32.xlu0 %v1835_v0, %s1789_s13  ;;  %600 = vrot.lane.b32.xlu1 %v1852_v3, %s1789_s13 }
  0x43   :  { %592 = vrot.lane.b32.xlu2 %v1840_v1, %s1789_s13 }
  0x4a   :  { %598 = vrot.lane.b32.xlu0 %v1861_v4, %s1789_s13  ;;  %590 = vrot.lane.b32.xlu1 %v1847_v2, %s1789_s13 }
  0x4b   :  { %596 = vrot.lane.b32.xlu2 %v1870_v5, %s1789_s13 }
  0x52   :  { %709 = vrot.lane.b32.xlu0 %v1835_v0, %s1790_s14  ;;  %715 = vrot.lane.b32.xlu1 %v1852_v3, %s1790_s14 }
  0x53   :  { %707 = vrot.lane.b32.xlu2 %v1840_v1, %s1790_s14 }
  0x5a   :  { %713 = vrot.lane.b32.xlu0 %v1861_v4, %s1790_s14  ;;  %705 = vrot.lane.b32.xlu1 %v1847_v2, %s1790_s14 }
  0x5b   :  { %711 = vrot.lane.b32.xlu2 %v1870_v5, %s1790_s14 }
  0x5d   :  { %v131_v8 = vpop.permute.xlu2 %130 }
  0x62   :  { %824 = vrot.lane.b32.xlu0 %v1835_v0, %s1791_s19  ;;  %830 = vrot.lane.b32.xlu1 %v1852_v3, %s1791_s19 }
  0x63   :  { %822 = vrot.lane.b32.xlu2 %v1840_v1, %s1791_s19 }
  0x65   :  { %v137_v10 = vpop.permute.xlu2 %136 }
  0x66   :  { %v145_v31 = vsel %vm144_vm1, %v131_v8, %v137_v10  ;;  %v148_v32 = vsel %vm144_vm1, %v137_v10, %v131_v8 }
  0x67   :  { %v158_v38 = vmul.f32 %v154_v23, %v145_v31  ;;  %v157_v39 = vmul.f32 %v153_v22, %v148_v32 }
  0x6a   :  { %828 = vrot.lane.b32.xlu0 %v1861_v4, %s1791_s19  ;;  %820 = vrot.lane.b32.xlu1 %v1847_v2, %s1791_s19 }
  0x6b   :  { %826 = vrot.lane.b32.xlu2 %v1870_v5, %s1791_s19 }
  0x6d   :  { %v1936_v13 = vpop.permute.xlu2 %247 }
  0x72   :  { %939 = vrot.lane.b32.xlu0 %v1835_v0, %s1793_s24  ;;  %945 = vrot.lane.b32.xlu1 %v1852_v3, %s1793_s24  ;;  %v382_v0 = vperm.slane %v1625_v61, 0 }
  0x73   :  { %937 = vrot.lane.b32.xlu2 %v1840_v1, %s1793_s24  ;;  %v383_v1 = vperm.slane %v1625_v61, 1  ;;  %v1629_v61 = vld [vmem:[%s2677_s1 + $0x58] sm:$0xff] }
  0x74   :  { %v135_v14 = vpop.permute.xlu0 %134  ;;  %v133_v15 = vpop.permute.xlu1 %132 }
  0x75   :  { %v252_v17 = vpop.permute.xlu2 %251 }
  0x7a   :  { %943 = vrot.lane.b32.xlu0 %v1861_v4, %s1793_s24  ;;  %935 = vrot.lane.b32.xlu1 %v1847_v2, %s1793_s24  ;;  %v165_v2 = vld [vmem:[%s2677_s1 + $0x10] sm:$0xff] }
  0x7b   :  { %941 = vrot.lane.b32.xlu2 %v1870_v5, %s1793_s24 }
  0x7c   :  { %v141_v20 = vpop.permute.xlu0 %140  ;;  %v139_v21 = vpop.permute.xlu1 %138 }
  0x7d   :  { %v147_v24 = vsel %vm144_vm1, %v135_v14, %v141_v20  ;;  %v150_v25 = vsel %vm144_vm1, %v141_v20, %v135_v14  ;;  %v146_v26 = vsel %vm144_vm1, %v133_v15, %v139_v21  ;;  %v149_v27 = vsel %vm144_vm1, %v139_v21, %v133_v15  ;;  %v1950_v28 = vpop.permute.xlu2 %362 }
  0x7e   :  { %v161_v29 = vmul.f32 %v153_v22, %v150_v25  ;;  %v162_v30 = vmul.f32 %v154_v23, %v147_v24  ;;  %v160_v34 = vmul.f32 %v154_v23, %v146_v26  ;;  %v159_v35 = vmul.f32 %v153_v22, %v149_v27  ;;  %v1638_v23 = vld [vmem:[%s2679_s3 + $0x3] ss:$8 sm:$0x3]  ;;  %v1615_v24 = vld [vmem:[%s2677_s1 + $0x30] sm:$0xff] }
  0x7f   :  { %v497_v25 = vperm.slane %v1638_v23, 0  ;;  %v498_v26 = vperm.slane %v1638_v23, 1  ;;  %v1626_v27 = vld [vmem:[%s2677_s1 + $0x40] sm:$0xff] }
  0x80   :  { %192 = vmatpush.msrb.mxu2 %v161_v29  ;;  %221 = vmatpush.msrb.mxu3 %v162_v30 }
  0x82   :  { %222 = vmatpush.msrb.mxu3 %v160_v34  ;;  %193 = vmatpush.msrb.mxu2 %v159_v35  ;;  %v1616_v35 = vld [vmem:[%s2677_s1 + $0x38] sm:$0xff] }
  0x83   :  { %41 = vperm.xlu0 %1739, %v35_v36   ;;  %46 = vperm.xlu1 %1740, %v36_v37   ;;  %v1627_v36 = vld [vmem:[%s2677_s1 + $0x48] sm:$0xff] }
  0x84   :  { %v250_v43 = vpop.permute.xlu0 %249  ;;  %v256_v44 = vpop.permute.xlu1 %255  ;;  %223 = vmatpush.msrb.mxu3 %v158_v38  ;;  %194 = vmatpush.msrb.mxu2 %v157_v39 }
  0x85   :  { %v260_v45 = vsel %vm257_vm2, %v250_v43, %v256_v44  ;;  %v263_v46 = vsel %vm257_vm2, %v256_v44, %v250_v43  ;;  %1604 = vmatmul.msk.f32.vlgmr.msrb.gmra.mxu2 %vm59_vm0, %v163_v40  ;;  %1608 = vmatmul.msk.f32.vlgmr.msrb.gmra.mxu3 %vm59_vm0, %v163_v40  ;;  %v367_v47 = vpop.permute.xlu2 %366 }
  0x86   :  { %v275_v48 = vmul.f32 %v267_v41, %v263_v46  ;;  %v276_v49 = vmul.f32 %v268_v42, %v260_v45 }
  0x88   :  { %307 = vmatpush.msrb.mxu0 %v275_v48  ;;  %336 = vmatpush.msrb.mxu1 %v276_v49  ;;  %v1651_v48 = vld [vmem:[%s2679_s3 + $0x5] ss:$8 sm:$0x3]  ;;  %v118_v18 = vpop.f32.mrf.mxu1 }
  0x89   :  { %v1639_v49 = vld [vmem:[%s2677_s1 + $0x60] sm:$0xff] }
  0x8c   :  { %v254_v51 = vpop.permute.xlu0 %253  ;;  %v246_v52 = vpop.permute.xlu1 %245 }
  0x8d   :  { %v259_v53 = vsel %vm257_vm2, %v1936_v13, %v254_v51  ;;  %v262_v54 = vsel %vm257_vm2, %v254_v51, %v1936_v13  ;;  %v258_v55 = vsel %vm257_vm2, %v246_v52, %v252_v17  ;;  %v261_v56 = vsel %vm257_vm2, %v252_v17, %v246_v52  ;;  %1605 = vmatmul.msk.f32.gmra.mxu2 %vm59_vm0, %v164_v50  ;;  %v1989_v62 = vpop.permute.xlu2 %477  ;;  %v1628_v52 = vld [vmem:[%s2677_s1 + $0x50] sm:$0xff] }
  0x8e   :  { %1609 = vmatmul.msk.f32.gmra.mxu3 %vm59_vm0, %v164_v50  ;;  %v273_v57 = vmul.f32 %v267_v41, %v262_v54  ;;  %v274_v58 = vmul.f32 %v268_v42, %v259_v53  ;;  %v271_v59 = vmul.f32 %v267_v41, %v261_v56  ;;  %v272_v60 = vmul.f32 %v268_v42, %v258_v55 }
  0x8f   :  { %v612_v50 = vperm.slane %v1651_v48, 0  ;;  %v613_v51 = vperm.slane %v1651_v48, 1 }
  0x90   :  { %308 = vmatpush.msrb.mxu0 %v273_v57  ;;  %337 = vmatpush.msrb.mxu1 %v274_v58 }
  0x92   :  { %309 = vmatpush.msrb.mxu0 %v271_v59  ;;  %338 = vmatpush.msrb.mxu1 %v272_v60  ;;  %v1640_v60 = vld [vmem:[%s2677_s1 + $0x68] sm:$0xff] }
  0x93   :  { %1617 = vmatmul.msk.f32.vlgmr.msrb.gmra.mxu0 %vm59_vm0, %v1613_v63  ;;  %1621 = vmatmul.msk.f32.vlgmr.msrb.gmra.mxu1 %vm59_vm0, %v1613_v63 }
  0x94   :  { %v365_v3 = vpop.permute.xlu0 %364  ;;  %v371_v4 = vpop.permute.xlu1 %370 }
  0x95   :  { %v375_v5 = vsel %vm372_vm3, %v365_v3, %v371_v4  ;;  %v378_v6 = vsel %vm372_vm3, %v371_v4, %v365_v3  ;;  %1606 = vmatmul.msk.f32.gmra.mxu2 %vm59_vm0, %v165_v2  ;;  %v482_v10 = vpop.permute.xlu2 %481 }
  0x96   :  { %v390_v7 = vmul.f32 %v382_v0, %v378_v6  ;;  %v391_v8 = vmul.f32 %v383_v1, %v375_v5  ;;  %1610 = vmatmul.msk.f32.gmra.mxu3 %vm59_vm0, %v165_v2 }
  0x98   :  { %422 = vmatpush.msra.mxu2 %v390_v7  ;;  %451 = vmatpush.msra.mxu3 %v391_v8  ;;  %v1664_v8 = vld [vmem:[%s2679_s3 + $0x6] ss:$8 sm:$0x3] }
  0x9b   :  { %1618 = vmatmul.msk.f32.gmra.mxu0 %vm59_vm0, %v1614_v9  ;;  %1622 = vmatmul.msk.f32.gmra.mxu1 %vm59_vm0, %v1614_v9  ;;  %v1641_v9 = vld [vmem:[%s2677_s1 + $0x70] sm:$0xff] }
  0x9c   :  { %v369_v12 = vpop.permute.xlu0 %368  ;;  %v361_v13 = vpop.permute.xlu1 %360 }
  0x9d   :  { %v374_v14 = vsel %vm372_vm3, %v1950_v28, %v369_v12  ;;  %v377_v15 = vsel %vm372_vm3, %v369_v12, %v1950_v28  ;;  %v373_v16 = vsel %vm372_vm3, %v361_v13, %v367_v47  ;;  %v376_v17 = vsel %vm372_vm3, %v367_v47, %v361_v13  ;;  %1607 = vmatmul.msk.f32.gmra.mxu2 %vm59_vm0, %v166_v11  ;;  %v593_v28 = vpop.permute.xlu2 %592  ;;  %v1652_v13 = vld [vmem:[%s2677_s1 + $0xa0] sm:$0xff] }
  0x9e   :  { %v388_v19 = vmul.f32 %v382_v0, %v377_v15  ;;  %v389_v20 = vmul.f32 %v383_v1, %v374_v14  ;;  %v386_v21 = vmul.f32 %v382_v0, %v376_v17  ;;  %v387_v22 = vmul.f32 %v383_v1, %v373_v16  ;;  %1611 = vmatmul.msk.f32.gmra.mxu3 %vm59_vm0, %v166_v11 }
  0x9f   :  { %v727_v11 = vperm.slane %v1664_v8, 0  ;;  %v728_v12 = vperm.slane %v1664_v8, 1 }
  0xa0   :  { %423 = vmatpush.msra.mxu2 %v388_v19  ;;  %452 = vmatpush.msra.mxu3 %v389_v20 }
  0xa2   :  { %424 = vmatpush.msra.mxu2 %v386_v21  ;;  %453 = vmatpush.msra.mxu3 %v387_v22  ;;  %v1642_v21 = vld [vmem:[%s2677_s1 + $0x78] sm:$0xff]  ;;  %v1653_v22 = vld [vmem:[%s2677_s1 + $0xa8] sm:$0xff] }
  0xa3   :  { %1619 = vmatmul.msk.f32.gmra.mxu0 %vm59_vm0, %v1615_v24  ;;  %1623 = vmatmul.msk.f32.gmra.mxu1 %vm59_vm0, %v1615_v24 }
  0xa4   :  { %v480_v29 = vpop.permute.xlu0 %479  ;;  %v486_v30 = vpop.permute.xlu1 %485 }
  0xa5   :  { %v490_v31 = vsel %vm487_vm4, %v480_v29, %v486_v30  ;;  %v493_v32 = vsel %vm487_vm4, %v486_v30, %v480_v29  ;;  %1630 = vmatmul.msk.f32.vlgmr.msra.gmra.mxu2 %vm59_vm0, %v1626_v27  ;;  %v597_v43 = vpop.permute.xlu2 %596 }
  0xa6   :  { %v505_v33 = vmul.f32 %v497_v25, %v493_v32  ;;  %v506_v34 = vmul.f32 %v498_v26, %v490_v31  ;;  %1634 = vmatmul.msk.f32.vlgmr.msra.gmra.mxu3 %vm59_vm0, %v1626_v27 }
  0xa8   :  { %537 = vmatpush.msra.mxu0 %v505_v33  ;;  %566 = vmatpush.msra.mxu1 %v506_v34  ;;  %v1677_v34 = vld [vmem:[%s2679_s3 + $0x7] ss:$8 sm:$0x3] }
  0xab   :  { %1620 = vmatmul.msk.f32.gmra.mxu0 %vm59_vm0, %v1616_v35  ;;  %1624 = vmatmul.msk.f32.gmra.mxu1 %vm59_vm0, %v1616_v35  ;;  %v1665_v35 = vld [vmem:[%s2677_s1 + $0xc0] sm:$0xff] }
  0xac   :  { %v484_v37 = vpop.permute.xlu0 %483  ;;  %v476_v38 = vpop.permute.xlu1 %475 }
  0xad   :  { %v489_v39 = vsel %vm487_vm4, %v1989_v62, %v484_v37  ;;  %v492_v40 = vsel %vm487_vm4, %v484_v37, %v1989_v62  ;;  %v488_v41 = vsel %vm487_vm4, %v476_v38, %v482_v10  ;;  %v491_v42 = vsel %vm487_vm4, %v482_v10, %v476_v38  ;;  %1631 = vmatmul.msk.f32.gmra.mxu2 %vm59_vm0, %v1627_v36  ;;  %v708_v59 = vpop.permute.xlu2 %707  ;;  %v1654_v38 = vld [vmem:[%s2677_s1 + $0xb0] sm:$0xff] }
  0xae   :  { %v503_v44 = vmul.f32 %v497_v25, %v492_v40  ;;  %v504_v45 = vmul.f32 %v498_v26, %v489_v39  ;;  %v501_v46 = vmul.f32 %v497_v25, %v491_v42  ;;  %v502_v47 = vmul.f32 %v498_v26, %v488_v41  ;;  %1635 = vmatmul.msk.f32.gmra.mxu3 %vm59_vm0, %v1627_v36 }
  0xaf   :  { %v842_v36 = vperm.slane %v1677_v34, 0  ;;  %v843_v37 = vperm.slane %v1677_v34, 1 }
  0xb0   :  { %538 = vmatpush.msra.mxu0 %v503_v44  ;;  %567 = vmatpush.msra.mxu1 %v504_v45 }
  0xb2   :  { %539 = vmatpush.msra.mxu0 %v501_v46  ;;  %568 = vmatpush.msra.mxu1 %v502_v47  ;;  %v1666_v46 = vld [vmem:[%s2677_s1 + $0xc8] sm:$0xff]  ;;  %v1655_v47 = vld [vmem:[%s2677_s1 + $0xb8] sm:$0xff] }
  0xb3   :  { %1643 = vmatmul.msk.f32.vlgmr.msra.gmra.mxu0 %vm59_vm0, %v1639_v49  ;;  %1647 = vmatmul.msk.f32.vlgmr.msra.gmra.mxu1 %vm59_vm0, %v1639_v49 }
  0xb4   :  { %v595_v53 = vpop.permute.xlu0 %594  ;;  %v601_v54 = vpop.permute.xlu1 %600 }
  0xb5   :  { %v605_v55 = vsel %vm602_vm5, %v595_v53, %v601_v54  ;;  %v608_v56 = vsel %vm602_vm5, %v601_v54, %v595_v53  ;;  %1632 = vmatmul.msk.f32.gmra.mxu2 %vm59_vm0, %v1628_v52  ;;  %v712_v10 = vpop.permute.xlu2 %711 }
  0xb6   :  { %v620_v57 = vmul.f32 %v612_v50, %v605_v55  ;;  %v621_v58 = vmul.f32 %v613_v51, %v608_v56  ;;  %1636 = vmatmul.msk.f32.gmra.mxu3 %vm59_vm0, %v1628_v52 }
  0xb8   :  { %652 = vmatpush.msrb.mxu2 %v620_v57  ;;  %681 = vmatpush.msrb.mxu3 %v621_v58  ;;  %v1690_v58 = vld [vmem:[%s2679_s3 + $0x10] ss:$8 sm:$0x3] }
  0xbb   :  { %1644 = vmatmul.msk.f32.gmra.mxu0 %vm59_vm0, %v1640_v60  ;;  %1648 = vmatmul.msk.f32.gmra.mxu1 %vm59_vm0, %v1640_v60 }
  0xbc   :  { %v599_v62 = vpop.permute.xlu0 %598  ;;  %v591_v63 = vpop.permute.xlu1 %590 }
  0xbd   :  { %v604_v0 = vsel %vm602_vm5, %v593_v28, %v599_v62  ;;  %v607_v1 = vsel %vm602_vm5, %v599_v62, %v593_v28  ;;  %v603_v2 = vsel %vm602_vm5, %v591_v63, %v597_v43  ;;  %v606_v3 = vsel %vm602_vm5, %v597_v43, %v591_v63  ;;  %1633 = vmatmul.msk.f32.gmra.mxu2 %vm59_vm0, %v1629_v61  ;;  %v823_v23 = vpop.permute.xlu2 %822  ;;  %v1678_v63 = vld [vmem:[%s2677_s1 + $0xe0] sm:$0xff] }
  0xbe   :  { %v618_v4 = vmul.f32 %v612_v50, %v604_v0  ;;  %v619_v5 = vmul.f32 %v613_v51, %v607_v1  ;;  %v616_v6 = vmul.f32 %v612_v50, %v603_v2  ;;  %v617_v7 = vmul.f32 %v613_v51, %v606_v3  ;;  %1637 = vmatmul.msk.f32.gmra.mxu3 %vm59_vm0, %v1629_v61 }
  0xbf   :  { %v957_v61 = vperm.slane %v1690_v58, 0  ;;  %v958_v62 = vperm.slane %v1690_v58, 1 }
  0xc0   :  { %653 = vmatpush.msrb.mxu2 %v618_v4  ;;  %682 = vmatpush.msrb.mxu3 %v619_v5 }
  0xc2   :  { %654 = vmatpush.msrb.mxu2 %v616_v6  ;;  %683 = vmatpush.msrb.mxu3 %v617_v7  ;;  %v1668_v6 = vld [vmem:[%s2677_s1 + $0xd8] sm:$0xff]  ;;  %v1679_v7 = vld [vmem:[%s2677_s1 + $0xe8] sm:$0xff] }
  0xc3   :  { %1645 = vmatmul.msk.f32.gmra.mxu0 %vm59_vm0, %v1641_v9  ;;  %1649 = vmatmul.msk.f32.gmra.mxu1 %vm59_vm0, %v1641_v9 }
  0xc4   :  { %v710_v14 = vpop.permute.xlu0 %709  ;;  %v716_v15 = vpop.permute.xlu1 %715 }
  0xc5   :  { %v720_v16 = vsel %vm717_vm6, %v710_v14, %v716_v15  ;;  %v723_v17 = vsel %vm717_vm6, %v716_v15, %v710_v14  ;;  %1656 = vmatmul.msk.f32.vlgmr.msrb.gmra.mxu2 %vm59_vm0, %v1652_v13  ;;  %v827_v45 = vpop.permute.xlu2 %826 }
  0xc6   :  { %v735_v19 = vmul.f32 %v727_v11, %v720_v16  ;;  %v736_v20 = vmul.f32 %v728_v12, %v723_v17  ;;  %1660 = vmatmul.msk.f32.vlgmr.msrb.gmra.mxu3 %vm59_vm0, %v1652_v13 }
  0xc8   :  { %767 = vmatpush.msrb.mxu0 %v735_v19  ;;  %796 = vmatpush.msrb.mxu1 %v736_v20  ;;  %v1691_v20 = vld [vmem:[%s2677_s1 + $0x100] sm:$0xff] }
  0xcb   :  { %1646 = vmatmul.msk.f32.gmra.mxu0 %vm59_vm0, %v1642_v21  ;;  %1650 = vmatmul.msk.f32.gmra.mxu1 %vm59_vm0, %v1642_v21  ;;  %v89_v21 = vpop.f32.mrf.mxu0 }
  0xcc   :  { %v714_v24 = vpop.permute.xlu0 %713  ;;  %v706_v25 = vpop.permute.xlu1 %705 }
  0xcd   :  { %v719_v26 = vsel %vm717_vm6, %v708_v59, %v714_v24  ;;  %v722_v27 = vsel %vm717_vm6, %v714_v24, %v708_v59  ;;  %v718_v28 = vsel %vm717_vm6, %v706_v25, %v712_v10  ;;  %v721_v29 = vsel %vm717_vm6, %v712_v10, %v706_v25  ;;  %1657 = vmatmul.msk.f32.gmra.mxu2 %vm59_vm0, %v1653_v22  ;;  %v1667_v59 = vld [vmem:[%s2677_s1 + $0xd0] sm:$0xff]  ;;  %v938_v60 = vpop.permute.xlu2 %937  ;;  %v121_v24 = vpop.f32.mrf.mxu1 }
  0xce   :  { %v733_v30 = vmul.f32 %v727_v11, %v719_v26  ;;  %v734_v31 = vmul.f32 %v728_v12, %v722_v27  ;;  %v731_v32 = vmul.f32 %v727_v11, %v718_v28  ;;  %v732_v33 = vmul.f32 %v728_v12, %v721_v29  ;;  %1661 = vmatmul.msk.f32.gmra.mxu3 %vm59_vm0, %v1653_v22  ;;  %v1692_v22 = vld [vmem:[%s2677_s1 + $0x108] sm:$0xff]  ;;  %v2218_v25 = vpop.f32.mrf.mxu2  ;;  %v2220_v26 = vpop.f32.mrf.mxu3 }
  0xd0   :  { %768 = vmatpush.msrb.mxu0 %v733_v30  ;;  %797 = vmatpush.msrb.mxu1 %v734_v31 }
  0xd2   :  { %769 = vmatpush.msrb.mxu0 %v731_v32  ;;  %798 = vmatpush.msrb.mxu1 %v732_v33 }
  0xd3   :  { %1669 = vmatmul.msk.f32.vlgmr.msrb.gmra.mxu0 %vm59_vm0, %v1665_v35  ;;  %1673 = vmatmul.msk.f32.vlgmr.msrb.gmra.mxu1 %vm59_vm0, %v1665_v35 }
  0xd4   :  { %v825_v39 = vpop.permute.xlu0 %824  ;;  %v831_v40 = vpop.permute.xlu1 %830 }
  0xd5   :  { %v835_v41 = vsel %vm832_vm7, %v825_v39, %v831_v40  ;;  %v838_v42 = vsel %vm832_vm7, %v831_v40, %v825_v39  ;;  %1658 = vmatmul.msk.f32.gmra.mxu2 %vm59_vm0, %v1654_v38  ;;  %v942_v8 = vpop.permute.xlu2 %941  ;;  %v2224_v30 = vpop.f32.mrf.mxu1 }
  0xd6   :  { %v850_v43 = vmul.f32 %v842_v36, %v835_v41  ;;  %v851_v44 = vmul.f32 %v843_v37, %v838_v42  ;;  %1662 = vmatmul.msk.f32.gmra.mxu3 %vm59_vm0, %v1654_v38 }
  0xd8   :  { %882 = vmatpush.msra.mxu2 %v850_v43  ;;  %911 = vmatpush.msra.mxu3 %v851_v44 }
  0xdb   :  { %1670 = vmatmul.msk.f32.gmra.mxu0 %vm59_vm0, %v1666_v46  ;;  %1674 = vmatmul.msk.f32.gmra.mxu1 %vm59_vm0, %v1666_v46 }
  0xdc   :  { %v829_v48 = vpop.permute.xlu0 %828  ;;  %v821_v49 = vpop.permute.xlu1 %820 }
  0xdd   :  { %v834_v50 = vsel %vm832_vm7, %v823_v23, %v829_v48  ;;  %v837_v51 = vsel %vm832_vm7, %v829_v48, %v823_v23  ;;  %v833_v52 = vsel %vm832_vm7, %v821_v49, %v827_v45  ;;  %v836_v53 = vsel %vm832_vm7, %v827_v45, %v821_v49  ;;  %1659 = vmatmul.msk.f32.gmra.mxu2 %vm59_vm0, %v1655_v47  ;;  %v92_v23 = vpop.f32.mrf.mxu0 }
  0xde   :  { %v848_v54 = vmul.f32 %v842_v36, %v834_v50  ;;  %v849_v55 = vmul.f32 %v843_v37, %v837_v51  ;;  %v846_v56 = vmul.f32 %v842_v36, %v833_v52  ;;  %v847_v57 = vmul.f32 %v843_v37, %v836_v53  ;;  %1663 = vmatmul.msk.f32.gmra.mxu3 %vm59_vm0, %v1655_v47 }
  0xe0   :  { %883 = vmatpush.msra.mxu2 %v848_v54  ;;  %912 = vmatpush.msra.mxu3 %v849_v55 }
  0xe2   :  { %884 = vmatpush.msra.mxu2 %v846_v56  ;;  %913 = vmatpush.msra.mxu3 %v847_v57 }
  0xe3   :  { %1671 = vmatmul.msk.f32.gmra.mxu0 %vm59_vm0, %v1667_v59  ;;  %1675 = vmatmul.msk.f32.gmra.mxu1 %vm59_vm0, %v1667_v59 }
  0xe4   :  { %v940_v0 = vpop.permute.xlu0 %939  ;;  %v946_v1 = vpop.permute.xlu1 %945 }
  0xe5   :  { %v950_v2 = vsel %vm947_vm8, %v940_v0, %v946_v1  ;;  %v953_v3 = vsel %vm947_vm8, %v946_v1, %v940_v0  ;;  %1682 = vmatmul.msk.f32.vlgmr.msra.gmra.mxu2 %vm59_vm0, %v1678_v63  ;;  %v2222_v29 = vpop.f32.mrf.mxu0 }
  0xe6   :  { %v965_v4 = vmul.f32 %v957_v61, %v950_v2  ;;  %v966_v5 = vmul.f32 %v958_v62, %v953_v3  ;;  %1686 = vmatmul.msk.f32.vlgmr.msra.gmra.mxu3 %vm59_vm0, %v1678_v63 }
  0xe8   :  { %997 = vmatpush.msra.mxu0 %v965_v4  ;;  %1026 = vmatpush.msra.mxu1 %v966_v5 }
  0xeb   :  { %1672 = vmatmul.msk.f32.gmra.mxu0 %vm59_vm0, %v1668_v6  ;;  %1676 = vmatmul.msk.f32.gmra.mxu1 %vm59_vm0, %v1668_v6 }
  0xec   :  { %v944_v9 = vpop.permute.xlu0 %943  ;;  %v936_v10 = vpop.permute.xlu1 %935 }
  0xed   :  { %v949_v11 = vsel %vm947_vm8, %v938_v60, %v944_v9  ;;  %v952_v12 = vsel %vm947_vm8, %v944_v9, %v938_v60  ;;  %1683 = vmatmul.msk.f32.gmra.mxu2 %vm59_vm0, %v1679_v7  ;;  %v948_v13 = vsel %vm947_vm8, %v936_v10, %v942_v8  ;;  %v951_v14 = vsel %vm947_vm8, %v942_v8, %v936_v10  ;;  %v1680_v9 = vld [vmem:[%s2677_s1 + $0xf0] sm:$0xff] }
  0xee   :  { %v963_v15 = vmul.f32 %v957_v61, %v949_v11  ;;  %v964_v16 = vmul.f32 %v958_v62, %v952_v12  ;;  %1687 = vmatmul.msk.f32.gmra.mxu3 %vm59_vm0, %v1679_v7  ;;  %v961_v17 = vmul.f32 %v957_v61, %v948_v13  ;;  %v962_v19 = vmul.f32 %v958_v62, %v951_v14  ;;  %v1693_v10 = vld [vmem:[%s2677_s1 + $0x110] sm:$0xff]  ;;  %v2294_v12 = vld [vmem:[%s2680_s4 + $0x78] sm:$0xff]  ;;  %v2301_v13 = vld [vmem:[%s2680_s4 + $0x60] sm:$0xff] }
  0xef   :  { %v2287_v11 = vld [vmem:[%s2680_s4 + $0x70] sm:$0xff]  ;;  %v2306_v14 = vld [vmem:[%s2680_s4 + $0x68] sm:$0xff]  ;;  %1104 = vmatpush.msrb.mxu3 %v2294_v12 }
  0xf0   :  { %998 = vmatpush.msra.mxu0 %v963_v15  ;;  %1027 = vmatpush.msra.mxu1 %v964_v16 }
  0xf1   :  { %1081 = vmatpush.msrb.mxu2 %v2287_v11  ;;  %1105 = vmatpush.msrb.mxu3 %v2306_v14 }
  0xf2   :  { %999 = vmatpush.msra.mxu0 %v961_v17  ;;  %1028 = vmatpush.msra.mxu1 %v962_v19  ;;  %v2323_v17 = vld [vmem:[%s2680_s4 + $0x50] sm:$0xff]  ;;  %v2328_v19 = vld [vmem:[%s2680_s4 + $0x58] sm:$0xff] }
  0xf3   :  { %1695 = vmatmul.msk.f32.vlgmr.msra.gmra.mxu0 %vm59_vm0, %v1691_v20  ;;  %1699 = vmatmul.msk.f32.vlgmr.msra.gmra.mxu1 %vm59_vm0, %v1691_v20 }
  0xf4   :  { %1207 = vmatpush.msrb.mxu0 %v2287_v11  ;;  %1230 = vmatpush.msrb.mxu1 %v2294_v12 }
  0xf5   :  { %v42_v27 = vpop.permute.xlu0 %41  ;;  %v47_v36 = vpop.permute.xlu1 %46  ;;  %1684 = vmatmul.msk.f32.gmra.mxu2 %vm59_vm0, %v1680_v9  ;;  %1106 = vmatpush.msrb.mxu3 %v2328_v19 }
  0xf6   :  { %v119_v28 = vadd.f32 %v118_v18, %v42_v27  ;;  %v90_v31 = vadd.f32 %v89_v21, %v42_v27  ;;  %v122_v37 = vadd.f32 %v121_v24, %v47_v36  ;;  %v93_v38 = vadd.f32 %v92_v23, %v47_v36  ;;  %1688 = vmatmul.msk.f32.gmra.mxu3 %vm59_vm0, %v1680_v9  ;;  %v2341_v18 = vld [vmem:[%s2680_s4 + $0x40] sm:$0xff]  ;;  %v1681_v23 = vld [vmem:[%s2677_s1 + $0xf8] sm:$0xff]  ;;  %v2361_v27 = vld [vmem:[%s2680_s4 + $0x30] sm:$0xff] }
  0xf7   :  { %1082 = vmatpush.msrb.mxu2 %v2301_v13  ;;  %1208 = vmatpush.msrb.mxu0 %v2301_v13  ;;  %v1694_v24 = vld [vmem:[%s2677_s1 + $0x118] sm:$0xff]  ;;  %s1581_s1 = sshll.u32 %s1796_s30, 4  ;;  %s1582_s1 = int_to_ptr.vmem [resolvable:$true] %s1581_s1 }
  0xf8   :  { %1231 = vmatpush.msrb.mxu1 %v2306_v14  ;;  %v2396_v36 = vld [vmem:[%s2680_s4 + $0x18] sm:$0xff] }
  0xf9   :  { %1083 = vmatpush.msrb.mxu2 %v2323_v17  ;;  %1209 = vmatpush.msrb.mxu0 %v2323_v17 }
  0xfa   :  { %1232 = vmatpush.msrb.mxu1 %v2328_v19 }
  0xfb   :  { %1696 = vmatmul.msk.f32.gmra.mxu0 %vm59_vm0, %v1692_v22  ;;  %1700 = vmatmul.msk.f32.gmra.mxu1 %vm59_vm0, %v1692_v22  ;;  %v2346_v22 = vld [vmem:[%s2680_s4 + $0x48] sm:$0xff] }
  0xfc   :  { %1084 = vmatpush.msrb.mxu2 %v2341_v18  ;;  %1107 = vmatpush.msrb.mxu3 %v2346_v22 }
  0xfd   :  { %1210 = vmatpush.msrb.mxu0 %v2341_v18  ;;  %1233 = vmatpush.msrb.mxu1 %v2346_v22 }
  0xfe   :  { %1685 = vmatmul.msk.f32.gmra.mxu2 %vm59_vm0, %v1681_v23  ;;  %1689 = vmatmul.msk.f32.gmra.mxu3 %vm59_vm0, %v1681_v23 }
  0xff   :  { %1085 = vmatpush.msrb.mxu2 %v2361_v27  ;;  %1211 = vmatpush.msrb.mxu0 %v2361_v27 }
 0x103   :  { %1697 = vmatmul.msk.f32.gmra.mxu0 %vm59_vm0, %v1693_v10  ;;  %1701 = vmatmul.msk.f32.gmra.mxu1 %vm59_vm0, %v1693_v10 }
 0x108   :  { %v196_v32 = vpop.f32.mrf.mxu2  ;;  %v225_v33 = vpop.f32.mrf.mxu3 }
 0x109   :  { %v237_v34 = vadd.f32 %v196_v32, %v90_v31  ;;  %v238_v35 = vadd.f32 %v225_v33, %v119_v28  ;;  %v2366_v28 = vld [vmem:[%s2680_s4 + $0x38] sm:$0xff]  ;;  %v2375_v31 = vld [vmem:[%s2680_s4 + $0x20] sm:$0xff]  ;;  %v2380_v32 = vld [vmem:[%s2680_s4 + $0x28] sm:$0xff] }
 0x10a   :  { %1108 = vmatpush.msrb.mxu3 %v2366_v28  ;;  %1234 = vmatpush.msrb.mxu1 %v2366_v28 }
 0x10b   :  { %1698 = vmatmul.msk.f32.gmra.mxu0 %vm59_vm0, %v1694_v24  ;;  %1702 = vmatmul.msk.f32.gmra.mxu1 %vm59_vm0, %v1694_v24 }
 0x10c   :  { %1086 = vmatpush.msrb.mxu2 %v2375_v31  ;;  %1109 = vmatpush.msrb.mxu3 %v2380_v32 }
 0x10d   :  { %1212 = vmatpush.msrb.mxu0 %v2375_v31  ;;  %1235 = vmatpush.msrb.mxu1 %v2380_v32 }
 0x10e   :  { %1110 = vmatpush.msrb.mxu3 %v2396_v36 }
 0x10f   :  { %1236 = vmatpush.msrb.mxu1 %v2396_v36 }
 0x110   :  { %v199_v39 = vpop.f32.mrf.mxu2  ;;  %v311_v40 = vpop.f32.mrf.mxu0 }
 0x111   :  { %v228_v41 = vpop.f32.mrf.mxu3  ;;  %v2226_v42 = vadd.f32 %v311_v40, %v237_v34  ;;  %v340_v43 = vpop.f32.mrf.mxu1  ;;  %v239_v44 = vadd.f32 %v199_v39, %v93_v38  ;;  %v2407_v39 = vld [vmem:[%s2680_s4] sm:$0xff]  ;;  %v2412_v40 = vld [vmem:[%s2680_s4 + $0x8] sm:$0xff] }
 0x112   :  { %v2228_v45 = vadd.f32 %v340_v43, %v238_v35  ;;  %v240_v46 = vadd.f32 %v228_v41, %v122_v37  ;;  %v2391_v35 = vld [vmem:[%s2680_s4 + $0x10] sm:$0xff]  ;;  %1111 = vmatpush.msrb.mxu3 %v2412_v40  ;;  %1237 = vmatpush.msrb.mxu1 %v2412_v40  ;;  %s1794_s4 = smov 64  }
 0x113   :  { %1087 = vmatpush.msrb.mxu2 %v2391_v35  ;;  %1213 = vmatpush.msrb.mxu0 %v2391_v35 }
 0x114   :  { %1166 = vmatpush.msra.mxu3 %v2294_v12 }
 0x115   :  { %1088 = vmatpush.msrb.mxu2 %v2407_v39  ;;  %1214 = vmatpush.msrb.mxu0 %v2407_v39 }
 0x116   :  { %1167 = vmatpush.msra.mxu3 %v2306_v14 }
 0x117   :  { %1143 = vmatpush.msra.mxu2 %v2287_v11 }
 0x118   :  { %v2230_v47 = vpop.f32.mrf.mxu2  ;;  %v314_v48 = vpop.f32.mrf.mxu0  ;;  %1168 = vmatpush.msra.mxu3 %v2328_v19 }
 0x119   :  { %v2232_v49 = vpop.f32.mrf.mxu3  ;;  %v2234_v50 = vadd.f32 %v314_v48, %v239_v44  ;;  %v343_v51 = vpop.f32.mrf.mxu1  ;;  %1144 = vmatpush.msra.mxu2 %v2301_v13 }
 0x11a   :  { %v2236_v52 = vadd.f32 %v343_v51, %v240_v46  ;;  %1169 = vmatpush.msra.mxu3 %v2346_v22 }
 0x11b   :  { %1145 = vmatpush.msra.mxu2 %v2323_v17 }
 0x11c   :  { %1170 = vmatpush.msra.mxu3 %v2366_v28 }
 0x11d   :  { %1146 = vmatpush.msra.mxu2 %v2341_v18 }
 0x11e   :  { %1171 = vmatpush.msra.mxu3 %v2380_v32 }
 0x11f   :  { %1147 = vmatpush.msra.mxu2 %v2361_v27 }
 0x120   :  { %v2238_v53 = vpop.f32.mrf.mxu2  ;;  %v2240_v54 = vpop.f32.mrf.mxu0  ;;  %1172 = vmatpush.msra.mxu3 %v2396_v36 }
 0x121   :  { %2683 = vst [vmem:[#allocation5_spill] sm:$0xff] %v2238_v53  ;;  %v2242_v55 = vpop.f32.mrf.mxu3  ;;  %v2244_v56 = vpop.f32.mrf.mxu1  ;;  %1148 = vmatpush.msra.mxu2 %v2375_v31 }
 0x122   :  { %2684 = vst [vmem:[#allocation6_spill] sm:$0xff] %v2242_v55  ;;  %1173 = vmatpush.msra.mxu3 %v2412_v40 }
 0x123   :  { %1149 = vmatpush.msra.mxu2 %v2391_v35 }
 0x125   :  { %1150 = vmatpush.msra.mxu2 %v2407_v39 }
 0x128   :  { %v2246_v57 = vpop.f32.mrf.mxu0  ;;  %v2248_v58 = vpop.f32.mrf.mxu2 }
 0x129   :  { %2685 = vst [vmem:[#allocation7_spill] sm:$0xff] %v2246_v57  ;;  %v2250_v59 = vpop.f32.mrf.mxu1  ;;  %v2252_v60 = vpop.f32.mrf.mxu3  ;;  %v467_v23 = vadd.f32 %v2248_v58, %v2226_v42 }
 0x12a   :  { %2686 = vst [vmem:[#allocation8_spill] sm:$0xff] %v2250_v59  ;;  %v468_v24 = vadd.f32 %v2252_v60, %v2228_v45 }
 0x130   :  { %v2254_v61 = vpop.f32.mrf.mxu2  ;;  %v2256_v62 = vpop.f32.mrf.mxu0 }
 0x131   :  { %v2258_v63 = vpop.f32.mrf.mxu3  ;;  %v2260_v0 = vpop.f32.mrf.mxu1  ;;  %v469_v42 = vadd.f32 %v2254_v61, %v2234_v50 }
 0x132   :  { %v470_v58 = vadd.f32 %v2258_v63, %v2236_v52 }
 0x138   :  { %v2262_v1 = vpop.f32.mrf.mxu2  ;;  %v2264_v2 = vpop.f32.mrf.mxu0 }
 0x139   :  { %v2266_v3 = vpop.f32.mrf.mxu3  ;;  %v2268_v4 = vpop.f32.mrf.mxu1 }
 0x140   :  { %v2270_v5 = vpop.f32.mrf.mxu2  ;;  %v2272_v6 = vpop.f32.mrf.mxu0 }
 0x141   :  { %2687 = vst [vmem:[#allocation9_spill] sm:$0xff] %v2270_v5  ;;  %v2274_v7 = vpop.f32.mrf.mxu3  ;;  %v2276_v8 = vpop.f32.mrf.mxu1 }
 0x142   :  { %2688 = vst [vmem:[#allocation10_spill] sm:$0xff] %v2274_v7 }
 0x148   :  { %v2316_v15 = vpop.f32.mrf.mxu0  ;;  %v2318_v16 = vpop.f32.mrf.mxu2 }
 0x149   :  { %2689 = vst [vmem:[#allocation11_spill] sm:$0xff] %v2316_v15  ;;  %v2330_v20 = vpop.f32.mrf.mxu1  ;;  %v2332_v21 = vpop.f32.mrf.mxu3  ;;  %v583_v15 = vadd.f32 %v2260_v0, %v468_v24  ;;  %v584_v0 = vadd.f32 %v2264_v2, %v469_v42 }
 0x14a   :  { %2690 = vst [vmem:[#allocation12_spill] sm:$0xff] %v2330_v20 }
 0x14b   :  { %v698_v57 = vadd.f32 %v2332_v21, %v583_v15  ;;  %v1337_v21 = vld [vmem:[%s2681_s5 + $0x70] sm:$0xff] }
 0x150   :  { %v2384_v33 = vpop.f32.mrf.mxu2  ;;  %v771_v34 = vpop.f32.mrf.mxu0 }
 0x151   :  { %v2398_v37 = vpop.f32.mrf.mxu3  ;;  %v800_v38 = vpop.f32.mrf.mxu1 }
 0x152   :  { %v813_v53 = vadd.f32 %v800_v38, %v698_v57  ;;  %v1331_v38 = vld [vmem:[%s2681_s5 + $0x40] sm:$0xff] }
 0x158   :  { %v2424_v41 = vpop.f32.mrf.mxu2  ;;  %v774_v43 = vpop.f32.mrf.mxu0 }
 0x159   :  { %v2426_v44 = vpop.f32.mrf.mxu3  ;;  %v803_v46 = vpop.f32.mrf.mxu1 }
 0x160   :  { %v2436_v48 = vpop.f32.mrf.mxu2  ;;  %v2438_v51 = vpop.f32.mrf.mxu0 }
 0x161   :  { %2691 = vst [vmem:[#allocation13_spill] sm:$0xff] %v2436_v48  ;;  %v2440_v9 = vpop.f32.mrf.mxu3  ;;  %v2442_v10 = vpop.f32.mrf.mxu1  ;;  %v582_v48 = vadd.f32 %v2256_v62, %v467_v23 }
 0x162   :  { %2692 = vst [vmem:[#allocation14_spill] sm:$0xff] %v2440_v9 }
 0x163   :  { %v697_v5 = vadd.f32 %v2318_v16, %v582_v48  ;;  %v585_v16 = vadd.f32 %v2268_v4, %v470_v58 }
 0x165   :  { %v812_v55 = vadd.f32 %v771_v34, %v697_v5  ;;  %v699_v5 = vadd.f32 %v2384_v33, %v584_v0  ;;  %v700_v50 = vadd.f32 %v2398_v37, %v585_v16  ;;  %v1350_v33 = vld [vmem:[%s2681_s5 + $0xd8] sm:$0xff]  ;;  %v1333_v34 = vld [vmem:[%s2681_s5 + $0x50] sm:$0xff]  ;;  %v1348_v37 = vld [vmem:[%s2681_s5 + $0xc8] sm:$0xff] }
 0x167   :  { %v814_v52 = vadd.f32 %v774_v43, %v699_v5  ;;  %v815_v57 = vadd.f32 %v803_v46, %v700_v50  ;;  %v1346_v43 = vld [vmem:[%s2681_s5 + $0xb8] sm:$0xff]  ;;  %v1329_v5 = vld [vmem:[%s2681_s5 + $0x30] sm:$0xff] }
 0x168   :  { %v2454_v9 = vpop.f32.mrf.mxu0  ;;  %v886_v7 = vpop.f32.mrf.mxu2 }
 0x169   :  { %v2457_v20 = vpop.f32.mrf.mxu1  ;;  %v915_v59 = vpop.f32.mrf.mxu3  ;;  %v927_v45 = vadd.f32 %v886_v7, %v812_v55 }
 0x16a   :  { %v928_v60 = vadd.f32 %v915_v59, %v813_v53 }
 0x170   :  { %v1001_v62 = vpop.f32.mrf.mxu0  ;;  %v889_v55 = vpop.f32.mrf.mxu2 }
 0x171   :  { %v1042_v23 = vadd.f32 %v1001_v62, %v927_v45  ;;  %v1030_v24 = vpop.f32.mrf.mxu1  ;;  %v918_v53 = vpop.f32.mrf.mxu3  ;;  %v929_v59 = vadd.f32 %v889_v55, %v814_v52 }
 0x172   :  { %v1043_v48 = vadd.f32 %v1030_v24, %v928_v60  ;;  %v930_v61 = vadd.f32 %v918_v53, %v815_v57  ;;  %v1326_v53 = vld [vmem:[%s2681_s5 + $0x18] sm:$0xff] }
 0x173   :  { %1127 = vrot.lane.b32.xlu2 %v1042_v23, %s1794_s4  ;;  %1703 = vmatmul.msk.f32.vlgmr.msrb.gmra.mxu2 %vm1066_vm9, %v1042_v23  ;;  %v1342_v57 = vld [vmem:[%s2681_s5 + $0x98] sm:$0xff] }
 0x174   :  { %1711 = vmatmul.msk.f32.vlgmr.msrb.gmra.mxu0 %vm1066_vm9, %v1043_v48  ;;  %1713 = vmatmul.msk.f32.vlgmr.msrb.gmra.mxu1 %vm1066_vm9, %v1043_v48 }
 0x175   :  { %1705 = vmatmul.msk.f32.vlgmr.msrb.gmra.mxu3 %vm1066_vm9, %v1042_v23  ;;  %1273 = vmatpush.msrb.mxu2 %v2287_v11  ;;  %v37_v11 = vld [vmem:[%s2678_s2 + $0x10] sm:$0xff] }
 0x176   :  { %1296 = vmatpush.msrb.mxu3 %v2294_v12 }
 0x177   :  { %1274 = vmatpush.msrb.mxu2 %v2301_v13 }
 0x178   :  { %v1004_v63 = vpop.f32.mrf.mxu0  ;;  %1297 = vmatpush.msrb.mxu3 %v2306_v14  ;;  %v892_v46 = vpop.f32.mrf.mxu2 }
 0x179   :  { %v1044_v2 = vadd.f32 %v1004_v63, %v929_v59  ;;  %v1033_v4 = vpop.f32.mrf.mxu1  ;;  %1275 = vmatpush.msrb.mxu2 %v2323_v17  ;;  %v1338_v17 = vld [vmem:[%s2681_s5 + $0x78] sm:$0xff]  ;;  %v921_v42 = vpop.f32.mrf.mxu3  ;;  %v1324_v63 = vld [vmem:[%s2681_s5 + $0x8] sm:$0xff] }
 0x17a   :  { %v1045_v7 = vadd.f32 %v1033_v4, %v930_v61  ;;  %1298 = vmatpush.msrb.mxu3 %v2328_v19  ;;  %v1354_v19 = vld [vmem:[%s2681_s5 + $0xf8] sm:$0xff]  ;;  %1355 = vmatpush.msra.mxu0 %v1338_v17  ;;  %v1341_v61 = vld [vmem:[%s2681_s5 + $0x90] sm:$0xff] }
 0x17b   :  { %1129 = vrot.lane.b32.xlu1 %v1044_v2, %s1794_s4  ;;  %1257 = vrot.lane.b32.xlu2 %v1043_v48, %s1794_s4 }
 0x17c   :  { %1259 = vrot.lane.b32.xlu0 %v1045_v7, %s1794_s4  ;;  %1712 = vmatmul.msk.f32.gmra.mxu0 %vm1066_vm9, %v1045_v7 }
 0x17d   :  { %1714 = vmatmul.msk.f32.gmra.mxu1 %vm1066_vm9, %v1045_v7  ;;  %1704 = vmatmul.msk.f32.gmra.mxu2 %vm1066_vm9, %v1044_v2 }
 0x17e   :  { %1706 = vmatmul.msk.f32.gmra.mxu3 %vm1066_vm9, %v1044_v2  ;;  %1276 = vmatpush.msrb.mxu2 %v2341_v18  ;;  %v1353_v18 = vld [vmem:[%s2681_s5 + $0xf0] sm:$0xff]  ;;  %v1339_v2 = vld [vmem:[%s2681_s5 + $0x80] sm:$0xff] }
 0x17f   :  { %1299 = vmatpush.msrb.mxu3 %v2346_v22  ;;  %1378 = vmatpush.msra.mxu1 %v1354_v19  ;;  %v1336_v22 = vld [vmem:[%s2681_s5 + $0x68] sm:$0xff] }
 0x180   :  { %1277 = vmatpush.msrb.mxu2 %v2361_v27  ;;  %v1352_v27 = vld [vmem:[%s2681_s5 + $0xe8] sm:$0xff]  ;;  %1356 = vmatpush.msra.mxu0 %v1337_v21 }
 0x181   :  { %1300 = vmatpush.msrb.mxu3 %v2366_v28  ;;  %1379 = vmatpush.msra.mxu1 %v1353_v18  ;;  %v1335_v28 = vld [vmem:[%s2681_s5 + $0x60] sm:$0xff]  ;;  %v2561_v62 = vpop.f32.mrf.mxu2  ;;  %v2563_v0 = vpop.f32.mrf.mxu3 }
 0x182   :  { %1278 = vmatpush.msrb.mxu2 %v2375_v31  ;;  %v1351_v31 = vld [vmem:[%s2681_s5 + $0xe0] sm:$0xff]  ;;  %1357 = vmatpush.msra.mxu0 %v1336_v22 }
 0x183   :  { %51 = vperm.xlu1 %1740, %v37_v11   ;;  %1301 = vmatpush.msrb.mxu3 %v2380_v32  ;;  %v1334_v32 = vld [vmem:[%s2681_s5 + $0x58] sm:$0xff]  ;;  %v1007_v11 = vpop.f32.mrf.mxu0 }
 0x184   :  { %1279 = vmatpush.msrb.mxu2 %v2391_v35  ;;  %1380 = vmatpush.msra.mxu1 %v1352_v27  ;;  %v1349_v35 = vld [vmem:[%s2681_s5 + $0xd0] sm:$0xff] }
 0x185   :  { %1302 = vmatpush.msrb.mxu3 %v2396_v36  ;;  %1358 = vmatpush.msra.mxu0 %v1335_v28  ;;  %v1332_v36 = vld [vmem:[%s2681_s5 + $0x48] sm:$0xff] }
 0x186   :  { %1280 = vmatpush.msrb.mxu2 %v2407_v39  ;;  %1381 = vmatpush.msra.mxu1 %v1351_v31  ;;  %v1347_v39 = vld [vmem:[%s2681_s5 + $0xc0] sm:$0xff] }
 0x187   :  { %1303 = vmatpush.msrb.mxu3 %v2412_v40  ;;  %1359 = vmatpush.msra.mxu0 %v1334_v32  ;;  %v1330_v40 = vld [vmem:[%s2681_s5 + $0x38] sm:$0xff] }
 0x188   :  { %1382 = vmatpush.msra.mxu1 %v1350_v33 }
 0x189   :  { %1360 = vmatpush.msra.mxu0 %v1333_v34 }
 0x18a   :  { %1383 = vmatpush.msra.mxu1 %v1349_v35 }
 0x18b   :  { %1361 = vmatpush.msra.mxu0 %v1332_v36  ;;  %v2619_v27 = vpop.f32.mrf.mxu0 }
 0x18c   :  { %1384 = vmatpush.msra.mxu1 %v1348_v37 }
 0x18d   :  { %1362 = vmatpush.msra.mxu0 %v1331_v38 }
 0x18e   :  { %1385 = vmatpush.msra.mxu1 %v1347_v39 }
 0x18f   :  { %1363 = vmatpush.msra.mxu0 %v1330_v40 }
 0x190   :  { %1386 = vmatpush.msra.mxu1 %v1346_v43 }
 0x191   :  { %1364 = vmatpush.msra.mxu0 %v1329_v5 }
 0x1cd   :  { %v1128_v12 = vpop.permute.xlu2 %1127 }
 0x1ce   :  { %1707 = vmatmul.msk.f32.vlgmr.msra.gmra.mxu2 %vm1066_vm9, %v1128_v12  ;;  %1709 = vmatmul.msk.f32.vlgmr.msra.gmra.mxu3 %vm1066_vm9, %v1128_v12  ;;  %v1036_v12 = vpop.f32.mrf.mxu1 }
 0x1d5   :  { %v1258_v14 = vpop.permute.xlu2 %1257 }
 0x1ed   :  { %v1130_v13 = vpop.permute.xlu1 %1129 }
 0x1ee   :  { %1708 = vmatmul.msk.f32.gmra.mxu2 %vm1066_vm9, %v1130_v13  ;;  %1710 = vmatmul.msk.f32.gmra.mxu3 %vm1066_vm9, %v1130_v13  ;;  %v1260_v15 = vpop.permute.xlu0 %1259 }
 0x1f1   :  { %v1216_v43 = vpop.f32.mrf.mxu0 }
 0x1f5   :  { %v52_v45 = vpop.permute.xlu1 %51 }
 0x1f6   :  { %1715 = vmatmul.msk.f32.vlgmr.msrb.gmra.mxu2 %vm1066_vm9, %v1258_v14  ;;  %1717 = vmatmul.msk.f32.vlgmr.msrb.gmra.mxu3 %vm1066_vm9, %v1258_v14  ;;  %v96_v58 = vadd.f32 %v2222_v29, %v52_v45  ;;  %v125_v60 = vadd.f32 %v2224_v30, %v52_v45  ;;  %v1345_v29 = vld [vmem:[%s2681_s5 + $0xb0] sm:$0xff]  ;;  %v1328_v30 = vld [vmem:[%s2681_s5 + $0x28] sm:$0xff]  ;;  %v1090_v55 = vpop.f32.mrf.mxu2 }
 0x1f7   :  { %1387 = vmatpush.msra.mxu1 %v1345_v29  ;;  %1365 = vmatpush.msra.mxu0 %v1328_v30 }
 0x1f8   :  { %v241_v23 = vadd.f32 %v2230_v47, %v96_v58  ;;  %v242_v24 = vadd.f32 %v2232_v49, %v125_v60  ;;  %v1344_v47 = vld [vmem:[%s2681_s5 + $0xa8] sm:$0xff]  ;;  %v1327_v49 = vld [vmem:[%s2681_s5 + $0x20] sm:$0xff]  ;;  %v1113_v52 = vpop.f32.mrf.mxu3 }
 0x1f9   :  { %1388 = vmatpush.msra.mxu1 %v1344_v47  ;;  %1366 = vmatpush.msra.mxu0 %v1327_v49 }
 0x1fa   :  { %v356_v16 = vadd.f32 %v2240_v54, %v241_v23  ;;  %v357_v48 = vadd.f32 %v2244_v56, %v242_v24  ;;  %v1343_v54 = vld [vmem:[%s2681_s5 + $0xa0] sm:$0xff] }
 0x1fb   :  { %1389 = vmatpush.msra.mxu1 %v1343_v54  ;;  %1367 = vmatpush.msra.mxu0 %v1326_v53 }
 0x1fc   :  { %v471_v56 = vadd.f32 %v2262_v1, %v356_v16  ;;  %v472_v50 = vadd.f32 %v2266_v3, %v357_v48  ;;  %v1325_v3 = vld [vmem:[%s2681_s5 + $0x10] sm:$0xff] }
 0x1fd   :  { %1390 = vmatpush.msra.mxu1 %v1342_v57  ;;  %1368 = vmatpush.msra.mxu0 %v1325_v3 }
 0x1fe   :  { %1716 = vmatmul.msk.f32.gmra.mxu2 %vm1066_vm9, %v1260_v15  ;;  %1718 = vmatmul.msk.f32.gmra.mxu3 %vm1066_vm9, %v1260_v15  ;;  %v586_v59 = vadd.f32 %v2272_v6, %v471_v56  ;;  %v587_v1 = vadd.f32 %v2276_v8, %v472_v50  ;;  %v1340_v6 = vld [vmem:[%s2681_s5 + $0x88] sm:$0xff]  ;;  %v1323_v8 = vld [vmem:[%s2681_s5] sm:$0xff] }
 0x1ff   :  { %1391 = vmatpush.msra.mxu1 %v1341_v61  ;;  %1369 = vmatpush.msra.mxu0 %v1324_v63 }
 0x200   :  { %v701_v4 = vadd.f32 %v2424_v41, %v586_v59  ;;  %v702_v7 = vadd.f32 %v2426_v44, %v587_v1  ;;  %v1093_v13 = vpop.f32.mrf.mxu2  ;;  %v2621_v41 = vpop.f32.mrf.mxu1 }
 0x201   :  { %1392 = vmatpush.msra.mxu1 %v1340_v6  ;;  %v1116_v14 = vpop.f32.mrf.mxu3  ;;  %1370 = vmatpush.msra.mxu0 %v1323_v8  ;;  %v1219_v8 = vpop.f32.mrf.mxu0 }
 0x202   :  { %v816_v15 = vadd.f32 %v2438_v51, %v701_v4  ;;  %v817_v17 = vadd.f32 %v2442_v10, %v702_v7 }
 0x203   :  { %1393 = vmatpush.msra.mxu1 %v1339_v2 }
 0x204   :  { %v931_v19 = vadd.f32 %v892_v46, %v816_v15  ;;  %v932_v21 = vadd.f32 %v921_v42, %v817_v17 }
 0x206   :  { %v1046_v44 = vadd.f32 %v1007_v11, %v931_v19  ;;  %v1047_v28 = vadd.f32 %v1036_v12, %v932_v21 }
 0x208   :  { %v1119_v31 = vperm.slane %v1046_v44, 0  ;;  %v1120_v32 = vperm.slane %v1047_v28, 0  ;;  %v1181_v33 = vperm.slane %v1046_v44, 1  ;;  %v1182_v34 = vperm.slane %v1047_v28, 1  ;;  %v1239_v46 = vpop.f32.mrf.mxu1 }
 0x209   :  { %v1245_v39 = vperm.slane %v1046_v44, 2  ;;  %v1246_v40 = vperm.slane %v1047_v28, 2  ;;  %v1123_v58 = vperm.slane %v1046_v44, 4  ;;  %v1124_v60 = vperm.slane %v1047_v28, 4 }
 0x20a   :  { %v1121_v38 = vmul.f32 %v1119_v31, %v1090_v55  ;;  %v1122_v10 = vmul.f32 %v1120_v32, %v1113_v52  ;;  %v1185_v16 = vperm.slane %v1046_v44, 5  ;;  %v1186_v48 = vperm.slane %v1047_v28, 5 }
 0x20b   :  { %v1247_v23 = vmul.f32 %v1245_v39, %v1216_v43  ;;  %v1248_v24 = vmul.f32 %v1246_v40, %v1239_v46  ;;  %v1311_v5 = vperm.slane %v1046_v44, 3  ;;  %v1312_v29 = vperm.slane %v1047_v28, 3 }
 0x20c   :  { %v1249_v53 = vperm.slane %v1046_v44, 6  ;;  %v1250_v57 = vperm.slane %v1047_v28, 6  ;;  %v1125_v59 = vmul.f32 %v1123_v58, %v1093_v13  ;;  %v1126_v1 = vmul.f32 %v1124_v60, %v1116_v14 }
 0x20d   :  { %v1315_v11 = vperm.slane %v1046_v44, 7  ;;  %v1316_v12 = vperm.slane %v1047_v28, 7 }
 0x20e   :  { %v1251_v4 = vmul.f32 %v1249_v53, %v1219_v8 }
 0x210   :  { %v1242_v2 = vpop.f32.mrf.mxu1 }
 0x211   :  { %v1252_v7 = vmul.f32 %v1250_v57, %v1242_v2 }
 0x251   :  { %v1152_v18 = vpop.f32.mrf.mxu2  ;;  %v1175_v22 = vpop.f32.mrf.mxu3 }
 0x252   :  { %v1183_v35 = vmul.f32 %v1181_v33, %v1152_v18  ;;  %v1184_v36 = vmul.f32 %v1182_v34, %v1175_v22 }
 0x254   :  { %v1189_v42 = vadd.f32 %v1183_v35, %v1121_v38  ;;  %v1190_v45 = vadd.f32 %v1184_v36, %v1122_v10 }
 0x256   :  { %v1253_v30 = vadd.f32 %v1247_v23, %v1189_v42  ;;  %v1254_v49 = vadd.f32 %v1248_v24, %v1190_v45 }
 0x271   :  { %v1155_v37 = vpop.f32.mrf.mxu2  ;;  %v1178_v51 = vpop.f32.mrf.mxu3 }
 0x272   :  { %v1187_v56 = vmul.f32 %v1185_v16, %v1155_v37  ;;  %v1188_v50 = vmul.f32 %v1186_v48, %v1178_v51 }
 0x274   :  { %v1191_v63 = vadd.f32 %v1187_v56, %v1125_v59  ;;  %v1192_v6 = vadd.f32 %v1188_v50, %v1126_v1 }
 0x276   :  { %v1255_v18 = vadd.f32 %v1251_v4, %v1191_v63  ;;  %v1256_v22 = vadd.f32 %v1252_v7, %v1192_v6 }
 0x279   :  { %v1282_v47 = vpop.f32.mrf.mxu2  ;;  %v1305_v54 = vpop.f32.mrf.mxu3 }
 0x27a   :  { %v1313_v55 = vmul.f32 %v1311_v5, %v1282_v47  ;;  %v1314_v52 = vmul.f32 %v1312_v29, %v1305_v54 }
 0x27c   :  { %v1319_v3 = vadd.f32 %v1313_v55, %v1253_v30  ;;  %v1320_v61 = vadd.f32 %v1314_v52, %v1254_v49 }
 0x27e   :  { %1371 = vmatmul.f32.vlgmr.msra.gmra.mxu0 %v1319_v3  ;;  %1394 = vmatmul.f32.vlgmr.msra.gmra.mxu1 %v1320_v61 }
 0x281   :  { %v1285_v15 = vpop.f32.mrf.mxu2  ;;  %v1308_v17 = vpop.f32.mrf.mxu3 }
 0x282   :  { %v1317_v19 = vmul.f32 %v1315_v11, %v1285_v15  ;;  %v1318_v21 = vmul.f32 %v1316_v12, %v1308_v17 }
 0x284   :  { %v1321_v13 = vadd.f32 %v1317_v19, %v1255_v18  ;;  %v1322_v14 = vadd.f32 %v1318_v21, %v1256_v22 }
 0x286   :  { %1374 = vmatmul.f32.gmra.mxu0 %v1321_v13  ;;  %1397 = vmatmul.f32.gmra.mxu1 %v1322_v14 }
 0x2fb   :  { %v1372_v31 = vpop.f32.mrf.mxu0  ;;  %v1395_v32 = vpop.f32.mrf.mxu1 }
 0x2fc   :  { %v1396_v33 = vadd.f32 %v1395_v32, %v1372_v31 }
 0x2fe   :  { %v1429_v34 = vsel %vm1428_vm10, %v1396_v33, -inf  ;;  %v1402_v51 = vsel %vm1401_vm11, %v1396_v33, -inf }
 0x2ff   :  { %1430 = vmax.xlane.f32.xlu1 %v1429_v34 }
 0x303   :  { %v1375_v35 = vpop.f32.mrf.mxu0  ;;  %v1398_v44 = vpop.f32.mrf.mxu1 }
 0x304   :  { %v1399_v28 = vadd.f32 %v1398_v44, %v1375_v35 }
 0x306   :  { %v1487_v36 = vsel %vm1428_vm10, %v1399_v28, -inf  ;;  %v1462_v37 = vsel %vm1401_vm11, %v1399_v28, -inf }
 0x307   :  { %1488 = vmax.xlane.f32.xlu2 %v1487_v36  ;;  %1463 = vmax.xlane.f32.xlu0 %v1462_v37 }
 0x30f   :  { %1403 = vmax.xlane.f32.xlu2 %v1402_v51 }
 0x372   :  { %v1431_v38 = vpop.xlane.xlu1 %1430 }
 0x373   :  { %v1433_v10 = vsel %vm1432_vm12, %v1431_v38, -inf }
 0x374   :  { %v1434_v39 = vrot.slane %v1433_v10, 4 }
 0x376   :  { %v1435_v40 = vmax.f32 %v1433_v10, %v1434_v39 }
 0x378   :  { %v1436_v43 = vrot.slane %v1435_v40, 2 }
 0x37a   :  { %v1437_v46 = vmax.f32 %v1435_v40, %v1436_v43  ;;  %v1489_v42 = vpop.xlane.xlu2 %1488  ;;  %v1464_v45 = vpop.xlane.xlu0 %1463 }
 0x37b   :  { %v1490_v58 = vsel %vm1432_vm12, %v1489_v42, -inf  ;;  %v1465_v60 = vsel %vm1405_vm13, %v1464_v45, -inf }
 0x37c   :  { %v1438_v23 = vrot.slane %v1437_v46, 1  ;;  %v1491_v24 = vrot.slane %v1490_v58, 4  ;;  %v1466_v16 = vrot.slane %v1465_v60, 4 }
 0x37e   :  { %v1439_v48 = vmax.f32 %v1437_v46, %v1438_v23  ;;  %v1492_v5 = vmax.f32 %v1490_v58, %v1491_v24  ;;  %v1467_v29 = vmax.f32 %v1465_v60, %v1466_v16 }
 0x380   :  { %v1440_v30 = vsub.f32 %v1396_v33, %v1439_v48  ;;  %v1493_v47 = vrot.slane %v1492_v5, 2  ;;  %v1468_v49 = vrot.slane %v1467_v29, 2 }
 0x382   :  { %v1494_v54 = vmax.f32 %v1492_v5, %v1493_v47  ;;  %v1469_v56 = vmax.f32 %v1467_v29, %v1468_v49  ;;  %v1404_v50 = vpop.xlane.xlu2 %1403  ;;  %v1441_v55 = vmul.f32 1.442695, %v1440_v30  ;;  %v2693_v29 = vld [vmem:[#allocation5_spill] sm:$0xff]  ;;  %v2694_v47 = vld [vmem:[#allocation6_spill] sm:$0xff] }
 0x383   :  { %v1406_v52 = vsel %vm1405_vm13, %v1404_v50, -inf }
 0x384   :  { %v1495_v53 = vrot.slane %v1494_v54, 1  ;;  %v1470_v57 = vrot.slane %v1469_v56, 1  ;;  %v1407_v59 = vrot.slane %v1406_v52, 4  ;;  %1741 = vpow2.f32 %v1441_v55  ;;  %v2696_v55 = vld [vmem:[#allocation8_spill] sm:$0xff] }
 0x386   :  { %v1496_v1 = vmax.f32 %v1494_v54, %v1495_v53  ;;  %v1471_v3 = vmax.f32 %v1469_v56, %v1470_v57  ;;  %v1408_v61 = vmax.f32 %v1406_v52, %v1407_v59  ;;  %v2695_v56 = vld [vmem:[#allocation7_spill] sm:$0xff]  ;;  %v2697_v59 = vld [vmem:[#allocation9_spill] sm:$0xff] }
 0x388   :  { %v1497_v63 = vsub.f32 %v1399_v28, %v1496_v1  ;;  %v1472_v6 = vsub.f32 %v1399_v28, %v1471_v3  ;;  %v1409_v8 = vrot.slane %v1408_v61, 2  ;;  %v2698_v3 = vld [vmem:[#allocation10_spill] sm:$0xff] }
 0x38a   :  { %v2629_v2 = vpop.eup %1741  ;;  %v1410_v4 = vmax.f32 %v1408_v61, %v1409_v8  ;;  %v1498_v7 = vmul.f32 1.442695, %v1497_v63  ;;  %v1473_v11 = vmul.f32 1.442695, %v1472_v6 }
 0x38b   :  { %v1443_v12 = vsel %vm1428_vm10, %v2629_v2, 0.0 }
 0x38c   :  { %v1411_v15 = vrot.slane %v1410_v4, 1  ;;  %1444 = vadd.xlane.f32.xlu1 %v1443_v12  ;;  %1743 = vpow2.f32 %v1498_v7 }
 0x38d   :  { %1745 = vpow2.f32 %v1473_v11  ;;  %v2702_v11 = vld [vmem:[#allocation14_spill] sm:$0xff] }
 0x38e   :  { %v1412_v17 = vmax.f32 %v1410_v4, %v1411_v15  ;;  %v2701_v4 = vld [vmem:[#allocation13_spill] sm:$0xff] }
 0x390   :  { %v1413_v19 = vsub.f32 %v1396_v33, %v1412_v17  ;;  %v38_v33 = vld [vmem:[%s2678_s2 + $0x18] sm:$0xff]  ;;  %s1795_s2 = smov 4  }
 0x392   :  { %v1744_v21 = vpop.eup %1743  ;;  %v1414_v18 = vmul.f32 1.442695, %v1413_v19 }
 0x393   :  { %v1746_v22 = vpop.eup %1745  ;;  %v1500_v13 = vsel %vm1428_vm10, %v1744_v21, 0.0 }
 0x394   :  { %1501 = vadd.xlane.f32.xlu2 %v1500_v13  ;;  %v1475_v14 = vsel %vm1401_vm11, %v1746_v22, 0.0  ;;  %1747 = vpow2.f32 %v1414_v18 }
 0x395   :  { %1476 = vadd.xlane.f32.xlu0 %v1475_v14 }
 0x39a   :  { %v2635_v31 = vpop.eup %1747 }
 0x39b   :  { %v1416_v32 = vsel %vm1401_vm11, %v2635_v31, 0.0 }
 0x39c   :  { %1417 = vadd.xlane.f32.xlu2 %v1416_v32 }
 0x3a9   :  { %56 = vperm.xlu0 %1739, %v38_v33  }
 0x3ff   :  { %v1445_v13 = vpop.xlane.xlu1 %1444 }
 0x400   :  { %v1447_v14 = vrot.slane %v1445_v13, 4 }
 0x402   :  { %v1449_v33 = vsel %vm1405_vm13, %v1447_v14, 0.0 }
 0x407   :  { %v1502_v34 = vpop.xlane.xlu2 %1501 }
 0x408   :  { %v1504_v35 = vrot.slane %v1502_v34, 4  ;;  %v1477_v44 = vpop.xlane.xlu0 %1476 }
 0x409   :  { %v1478_v28 = vsel %vm1405_vm13, %v1477_v44, 0.0 }
 0x40a   :  { %v1506_v36 = vsel %vm1405_vm13, %v1504_v35, 0.0  ;;  %v1479_v37 = vrot.slane %v1478_v28, 4 }
 0x40b   :  { %v1507_v51 = vrot.slane %v1506_v36, 4 }
 0x40c   :  { %v1480_v38 = vadd.f32 %v1479_v37, %v1478_v28 }
 0x40d   :  { %v1508_v10 = vadd.f32 %v1507_v51, %v1506_v36 }
 0x40e   :  { %v1481_v39 = vrot.slane %v1480_v38, 2 }
 0x40f   :  { %v1509_v40 = vrot.slane %v1508_v10, 2  ;;  %v1418_v32 = vpop.xlane.xlu2 %1417 }
 0x410   :  { %v1482_v43 = vadd.f32 %v1481_v39, %v1480_v38  ;;  %v1419_v34 = vsel %vm1405_vm13, %v1418_v32, 0.0 }
 0x411   :  { %v1510_v46 = vadd.f32 %v1509_v40, %v1508_v10  ;;  %v1420_v35 = vrot.slane %v1419_v34, 4 }
 0x412   :  { %v1483_v42 = vrot.slane %v1482_v43, 1 }
 0x413   :  { %v1511_v45 = vrot.slane %v1510_v46, 1  ;;  %v1421_v44 = vadd.f32 %v1420_v35, %v1419_v34 }
 0x414   :  { %v1484_v58 = vadd.f32 %v1483_v42, %v1482_v43 }
 0x415   :  { %v1512_v60 = vadd.f32 %v1511_v45, %v1510_v46  ;;  %v1422_v28 = vrot.slane %v1421_v44, 2 }
 0x416   :  { %1749 = vrcp.f32 %v1484_v58 }
 0x417   :  { %1751 = vrcp.f32 %v1512_v60  ;;  %v1423_v36 = vadd.f32 %v1422_v28, %v1421_v44 }
 0x419   :  { %v1424_v37 = vrot.slane %v1423_v36, 1 }
 0x41b   :  { %v57_v23 = vpop.permute.xlu0 %56  ;;  %v1425_v51 = vadd.f32 %v1424_v37, %v1423_v36 }
 0x41c   :  { %v1750_v24 = vpop.eup %1749  ;;  %v99_v16 = vadd.f32 %v2218_v25, %v57_v23  ;;  %v128_v48 = vadd.f32 %v2220_v26, %v57_v23  ;;  %v2699_v25 = vld [vmem:[#allocation11_spill] sm:$0xff]  ;;  %v2700_v26 = vld [vmem:[#allocation12_spill] sm:$0xff] }
 0x41d   :  { %v1752_v5 = vpop.eup %1751  ;;  %v1486_v53 = vmul.f32 %v1750_v24, %v1746_v22  ;;  %v1757_v24 = vld [vmem:[%s2676_s0] sm:$0xff] }
 0x41e   :  { %v243_v30 = vadd.f32 %v2693_v29, %v99_v16  ;;  %v244_v49 = vadd.f32 %v2694_v47, %v128_v48  ;;  %v1514_v54 = vmul.f32 %v1752_v5, %v1744_v21  ;;  %v1758_v48 = vld [vmem:[%s2676_s0 + $0x8] sm:$0xff] }
 0x420   :  { %v358_v50 = vadd.f32 %v2695_v56, %v243_v30  ;;  %v359_v52 = vadd.f32 %v2696_v55, %v244_v49  ;;  %v1516_v57 = vrot.slane %v1514_v54, 4 }
 0x422   :  { %v473_v1 = vadd.f32 %v2697_v59, %v358_v50  ;;  %v474_v61 = vadd.f32 %v2698_v3, %v359_v52  ;;  %v1518_v63 = vadd.f32 %v1516_v57, %v1486_v53 }
 0x424   :  { %v588_v6 = vadd.f32 %v2699_v25, %v473_v1  ;;  %v589_v8 = vadd.f32 %v2700_v26, %v474_v61  ;;  %1522 = vrot.lane.b32.xlu1 %v1518_v63, %s1795_s2 }
 0x426   :  { %v703_v7 = vadd.f32 %v2701_v4, %v588_v6  ;;  %v704_v12 = vadd.f32 %v2702_v11, %v589_v8 }
 0x428   :  { %v818_v15 = vadd.f32 %v2454_v9, %v703_v7  ;;  %v819_v17 = vadd.f32 %v2457_v20, %v704_v12  ;;  %v1450_v9 = vrot.slane %v1449_v33, 4 }
 0x42a   :  { %v933_v19 = vadd.f32 %v2561_v62, %v818_v15  ;;  %v934_v21 = vadd.f32 %v2563_v0, %v819_v17  ;;  %v1451_v20 = vadd.f32 %v1450_v9, %v1449_v33 }
 0x42c   :  { %v1048_v18 = vadd.f32 %v2619_v27, %v933_v19  ;;  %v1049_v22 = vadd.f32 %v2621_v41, %v934_v21  ;;  %v1452_v62 = vrot.slane %v1451_v20, 2 }
 0x42e   :  { %1549 = vmatpush.msra.mxu2 %v1048_v18  ;;  %1569 = vmatpush.msra.mxu3 %v1049_v22  ;;  %v1453_v0 = vadd.f32 %v1452_v62, %v1451_v20 }
 0x430   :  { %v1454_v27 = vrot.slane %v1453_v0, 1 }
 0x432   :  { %v1455_v41 = vadd.f32 %v1454_v27, %v1453_v0 }
 0x434   :  { %1753 = vrcp.f32 %v1455_v41 }
 0x435   :  { %1755 = vrcp.f32 %v1425_v51 }
 0x43a   :  { %v1754_v38 = vpop.eup %1753 }
 0x43b   :  { %v1756_v10 = vpop.eup %1755  ;;  %v1457_v39 = vmul.f32 %v1754_v38, %v2629_v2 }
 0x43c   :  { %v1427_v40 = vmul.f32 %v1756_v10, %v2635_v31 }
 0x43d   :  { %v1459_v43 = vrot.slane %v1457_v39, 4 }
 0x43f   :  { %v1461_v46 = vadd.f32 %v1459_v43, %v1427_v40 }
 0x441   :  { %v1520_v60 = vsel %vm1519_vm14, %v1461_v46, 0.0 }
 0x496   :  { %v1523_v42 = vpop.permute.xlu1 %1522 }
 0x497   :  { %v1525_v45 = vsel %vm1519_vm14, 0.0, %v1523_v42 }
 0x498   :  { %v1527_v58 = vrot.slane %v1525_v45, 4 }
 0x49a   :  { %v1529_v23 = vsel %vm1405_vm13, %v1520_v60, %v1527_v58 }
 0x49b   :  { %1719 = vmatmul.msk.f32.vlgmr.msra.gmra.mxu2 %vm1530_vm15, %v1529_v23  ;;  %1720 = vmatmul.msk.f32.vlgmr.msra.gmra.mxu3 %vm1530_vm15, %v1529_v23 }
 0x51e   :  { %v1551_v2 = vpop.f32.mrf.mxu2  ;;  %v1571_v31 = vpop.f32.mrf.mxu3 }
 0x51f   :  { %v1552_v16 = vadd.f32 %v1757_v24, %v1551_v2  ;;  %v1572_v5 = vadd.f32 %v1758_v48, %v1571_v31 }
 0x521   :  { %1574 = vst [vmem:[#allocation2] sm:$0xff] %v1552_v16 }
 0x522   :  { %1575 = vst [vmem:[#allocation2 + $0x8] sm:$0xff] %v1572_v5 }
 0x523   :  { %1586 = dma.vmem_to_hbm [thread:$0]  %s1582_s1, 256, %s1584_s9, [#allocation3]  }
 0x524   :  { %1783 = dma.done.wait [#allocation3], 256  }
 0x525   :  { %1784 = vsyncadd [#allocation3], 4294967040 }
 0x526   :  { %1591 = vsyncpa [#allocation3], 1 }

</bundles_post_ra>
